<compile_context>
chip_gen: v7x
topology: tpu7x:2x2x1
jax: 0.10.0
libtpu: 0.0.40
codegen_flags: <defaults>
</compile_context>

<pallas_src>
import math
import jax
import jax.numpy as jnp
from jax import lax
from jax.experimental import pallas as pl
from jax.experimental.pallas import tpu as pltpu

# ----------------------------- problem sizes -----------------------------
B = 2            # batch
A = 3            # "group" dim (dim 1 of the 4-D input)
S = 8            # seq length == args.max_atom (fc3 consumes this axis)
IN = 16          # input_size
HID = 32         # hidden_size
H = 4            # num_attention_heads
D = HID // H     # attention_head_size = 8
HH = HID * H     # fc3 output = hidden_size * num_heads = 128
N = B * A        # 6 independent (S, IN) slabs
PROJ = 2 * HID + H   # fused projection width: [Q | K | folded-V] = 68


# ------------------------------- kernel ----------------------------------
def self_attention_kernel(x_ref, wproj_ref, bproj_ref, w3_ref, b3f_ref, out_ref):
    # One fused projection for Q (pre-scaled), K and the folded V/fc1/fc2 path.
    proj = jnp.dot(x_ref[...], wproj_ref[...],
                   preferred_element_type=jnp.float32) + bproj_ref[...]  # (N*S, PROJ)

    cols = []
    for n in range(N):                      # static loop; 8-row sublane-aligned views
        pn = proj[n * S:(n + 1) * S, :]     # (S, PROJ) = (8, 68)
        c2n = jnp.zeros((S, 1), jnp.float32)
        for h in range(H):                  # static head loop
            qh = pn[:, h * D:(h + 1) * D]                    # (8, 8), scale folded into Wq
            kh = pn[:, HID + h * D:HID + (h + 1) * D]        # (8, 8)
            s = lax.dot_general(qh, kh, (((1,), (1,)), ((), ())),
                                preferred_element_type=jnp.float32)       # (8, 8)
            # numerically stable softmax (exact division to match reference)
            s = s - jnp.max(s, axis=-1, keepdims=True)
            p = jnp.exp(s)
            p = p / jnp.sum(p, axis=-1, keepdims=True)
            # folded fc1*fc2 value column for this head: p @ (v_h @ w1 * w2[h])
            vcol = pn[:, 2 * HID + h:2 * HID + h + 1]                     # (8, 1)
            c2n = c2n + jnp.dot(p, vcol, preferred_element_type=jnp.float32)
        cols.append(c2n)

    c2T = jnp.concatenate(cols, axis=1)      # (S, N) = (8, 6)
    # fc3: contract the seq axis; single lane-dense (6, 128) result + store.
    out = lax.dot_general(c2T, w3_ref[...], (((0,), (0,)), ((), ())),
                          preferred_element_type=jnp.float32)             # (N, HH)
    out_ref[...] = out + b3f_ref[...]


# ------------------------------- wrapper ----------------------------------
def self_attention(x, params):
    (wq, bq, wk, bk, wv, bv, w1, b1, w2, b2, w3, b3) = params

    scale = 1.0 / math.sqrt(D)
    # Fold the 1/sqrt(D) attention scale into the Q projection (exact).
    wq_s, bq_s = wq * scale, bq * scale

    # Fold fc1 (Linear(D,1)) and fc2's per-head weight into the V projection:
    #   (p @ v_h) @ w1 * w2[h] == p @ (x @ (wv_h @ w1) * w2[h] + bv_h @ w1 * w2[h])
    w1c = w1[:, 0]                                    # (D,)
    w2c = w2[:, 0]                                    # (H,)
    wu = jnp.einsum('ihd,d->ih', wv.reshape(IN, H, D), w1c)   # (IN, H)
    bu = jnp.einsum('hd,d->h', bv.reshape(H, D), w1c)         # (H,)
    wvf = wu * w2c[None, :]                           # (IN, H)
    bvf = (bu * w2c)[None, :]                         # (1, H)

    # Fold fc1/fc2 biases exactly into fc3's bias:
    #   c2 = c2_raw + (b1*sum(w2) + b2)  =>  out = c2_raw@w3 + (b3 + const*sum_s w3)
    c2_const = b1[0, 0] * jnp.sum(w2c) + b2[0, 0]
    b3f = b3 + c2_const * jnp.sum(w3, axis=0, keepdims=True)  # (1, HH)

    wproj = jnp.concatenate([wq_s, wk, wvf], axis=1)  # (IN, PROJ) = (16, 68)
    bproj = jnp.concatenate([bq_s, bk, bvf], axis=1)  # (1, PROJ)

    x2d = x.reshape(N * S, IN)                        # (48, 16)

    full = lambda arr: pl.BlockSpec(arr.shape, lambda i: (0,) * arr.ndim)

    out = pl.pallas_call(
        self_attention_kernel,
        out_shape=jax.ShapeDtypeStruct((N, HH), jnp.float32),
        grid_spec=pltpu.PrefetchScalarGridSpec(
            num_scalar_prefetch=0,
            grid=(1,),    # whole problem in one invocation (overhead dominated)
            in_specs=[full(x2d), full(wproj), full(bproj), full(w3), full(b3f)],
            out_specs=pl.BlockSpec((N, HH), lambda i: (0, 0)),
        ),
        compiler_params=pltpu.CompilerParams(
            dimension_semantics=("arbitrary",)),
    )(x2d, wproj, bproj, w3, b3f)
    return out.reshape(B, A, HH)


# --------------------------- pure-JAX reference ----------------------------
def reference(x, params):
    (wq, bq, wk, bk, wv, bv, w1, b1, w2, b2, w3, b3) = params
    q = x @ wq + bq[0]          # (B, A, S, HID)
    k = x @ wk + bk[0]
    v = x @ wv + bv[0]

    def heads(t):               # (B,A,S,HID) -> (B,A,H,S,D)
        return t.reshape(B, A, S, H, D).transpose(0, 1, 3, 2, 4)

    qh, kh, vh = heads(q), heads(k), heads(v)
    scores = jnp.einsum('bahsd,bahtd->bahst', qh, kh) / math.sqrt(D)
    probs = jax.nn.softmax(scores, axis=-1)
    ctx = jnp.einsum('bahst,bahtd->bahsd', probs, vh)
    ctx = ctx.transpose(0, 1, 3, 2, 4)                      # (B,A,S,H,D)
    c1 = (ctx @ w1)[..., 0] + b1[0, 0]                      # (B,A,S,H)
    c2 = (c1 @ w2)[..., 0] + b2[0, 0]                       # (B,A,S)
    out = c2 @ w3 + b3[0]                                   # (B,A,HH)
    return out


# --------------------------------- main ------------------------------------
if __name__ == "__main__":
    key = jax.random.PRNGKey(0)
    keys = jax.random.split(key, 16)

    def mk(k, shape, scale=0.1):
        return (scale * jax.random.normal(k, shape)).astype(jnp.float32)

    wq = mk(keys[0], (IN, HID));  bq = mk(keys[1], (1, HID))
    wk = mk(keys[2], (IN, HID));  bk = mk(keys[3], (1, HID))
    wv = mk(keys[4], (IN, HID));  bv = mk(keys[5], (1, HID))
    w1 = mk(keys[6], (D, 1));     b1 = mk(keys[7], (1, 1))
    w2 = mk(keys[8], (H, 1));     b2 = mk(keys[9], (1, 1))
    w3 = mk(keys[10], (S, HH));   b3 = mk(keys[11], (1, HH))
    params = (wq, bq, wk, bk, wv, bv, w1, b1, w2, b2, w3, b3)

    x = mk(keys[12], (B, A, S, IN), scale=1.0)

    out = self_attention(x, params)
    out = jax.block_until_ready(out)

    ref = reference(x, params)
    assert out.shape == (B, A, HH), out.shape
    assert jnp.allclose(out, ref, atol=2e-4, rtol=2e-4), \
        float(jnp.max(jnp.abs(out - ref)))

    print("KERNEL_OK")
</pallas_src>

<mosaic_0001>
module attributes {stable_mosaic.version = 11 : i64} {
  func.func @self_attention_kernel(%arg0: i32, %arg1: memref<48x16xf32, #tpu.memory_space<vmem>>, %arg2: memref<16x68xf32, #tpu.memory_space<vmem>>, %arg3: memref<1x68xf32, #tpu.memory_space<vmem>>, %arg4: memref<8x128xf32, #tpu.memory_space<vmem>>, %arg5: memref<1x128xf32, #tpu.memory_space<vmem>>, %arg6: memref<6x128xf32, #tpu.memory_space<vmem>>) attributes {dimension_semantics = [#tpu.dimension_semantics<arbitrary>], iteration_bounds = array<i64: 1>, scalar_prefetch = 0 : i64, scratch_operands = 0 : i64, tpu.core_type = #tpu.core_type<tc>, window_params = [{pipeline_mode = #tpu.pipeline_mode<synchronous>, transform_indices = @transform_0, window_bounds = array<i64: 48, 16>}, {pipeline_mode = #tpu.pipeline_mode<synchronous>, transform_indices = @transform_1, window_bounds = array<i64: 16, 68>}, {pipeline_mode = #tpu.pipeline_mode<synchronous>, transform_indices = @transform_2, window_bounds = array<i64: 1, 68>}, {pipeline_mode = #tpu.pipeline_mode<synchronous>, transform_indices = @transform_3, window_bounds = array<i64: 8, 128>}, {pipeline_mode = #tpu.pipeline_mode<synchronous>, transform_indices = @transform_4, window_bounds = array<i64: 1, 128>}, {pipeline_mode = #tpu.pipeline_mode<synchronous>, transform_indices = @transform_5, window_bounds = array<i64: 6, 128>}]} {
    %c0 = arith.constant 0 : index
    %c0_0 = arith.constant 0 : index
    %0 = vector.load %arg1[%c0, %c0_0] : memref<48x16xf32, #tpu.memory_space<vmem>>, vector<48x16xf32>
    %c0_1 = arith.constant 0 : index
    %c0_2 = arith.constant 0 : index
    %1 = vector.load %arg2[%c0_1, %c0_2] : memref<16x68xf32, #tpu.memory_space<vmem>>, vector<16x68xf32>
    %cst = arith.constant dense<0.000000e+00> : vector<48x68xf32>
    %2 = tpu.matmul %0, %1, %cst {dimension_numbers = #tpu.dot_dimension_numbers<[1], [0], [0], [1], [0, 0, 1, 1], [], []>} : vector<48x16xf32>, vector<16x68xf32>, vector<48x68xf32> -> vector<48x68xf32>
    %c0_3 = arith.constant 0 : index
    %c0_4 = arith.constant 0 : index
    %3 = vector.load %arg3[%c0_3, %c0_4] : memref<1x68xf32, #tpu.memory_space<vmem>>, vector<1x68xf32>
    %4 = vector.broadcast %3 : vector<1x68xf32> to vector<48x68xf32>
    %5 = arith.addf %2, %4 : vector<48x68xf32>
    %6 = vector.extract_strided_slice %5 {offsets = [0, 0], sizes = [8, 68], strides = [1, 1]} : vector<48x68xf32> to vector<8x68xf32>
    %cst_5 = arith.constant 0.000000e+00 : f32
    %7 = vector.broadcast %cst_5 : f32 to vector<8x1xf32>
    %8 = vector.extract_strided_slice %6 {offsets = [0, 0], sizes = [8, 8], strides = [1, 1]} : vector<8x68xf32> to vector<8x8xf32>
    %9 = vector.extract_strided_slice %6 {offsets = [0, 32], sizes = [8, 8], strides = [1, 1]} : vector<8x68xf32> to vector<8x8xf32>
    %cst_6 = arith.constant dense<0.000000e+00> : vector<8x8xf32>
    %10 = tpu.matmul %8, %9, %cst_6 {dimension_numbers = #tpu.dot_dimension_numbers<[1], [1], [0], [0], [0, 0, 1, 0], [], []>} : vector<8x8xf32>, vector<8x8xf32>, vector<8x8xf32> -> vector<8x8xf32>
    %cst_7 = arith.constant dense<0xFF800000> : vector<8xf32>
    %11 = vector.multi_reduction <maximumf>, %10, %cst_7 [1] : vector<8x8xf32> to vector<8xf32>
    %12 = vector.shape_cast %11 : vector<8xf32> to vector<8x1xf32>
    %13 = vector.broadcast %12 : vector<8x1xf32> to vector<8x8xf32>
    %14 = arith.subf %10, %13 : vector<8x8xf32>
    %15 = math.exp %14 : vector<8x8xf32>
    %cst_8 = arith.constant dense<0.000000e+00> : vector<8xf32>
    %16 = vector.multi_reduction <add>, %15, %cst_8 [1] : vector<8x8xf32> to vector<8xf32>
    %17 = vector.shape_cast %16 : vector<8xf32> to vector<8x1xf32>
    %18 = vector.broadcast %17 : vector<8x1xf32> to vector<8x8xf32>
    %19 = arith.divf %15, %18 : vector<8x8xf32>
    %20 = vector.extract_strided_slice %6 {offsets = [0, 64], sizes = [8, 1], strides = [1, 1]} : vector<8x68xf32> to vector<8x1xf32>
    %cst_9 = arith.constant dense<0.000000e+00> : vector<8x1xf32>
    %21 = tpu.matmul %19, %20, %cst_9 {dimension_numbers = #tpu.dot_dimension_numbers<[1], [0], [0], [1], [0, 0, 1, 1], [], []>} : vector<8x8xf32>, vector<8x1xf32>, vector<8x1xf32> -> vector<8x1xf32>
    %22 = arith.addf %7, %21 : vector<8x1xf32>
    %23 = vector.extract_strided_slice %6 {offsets = [0, 8], sizes = [8, 8], strides = [1, 1]} : vector<8x68xf32> to vector<8x8xf32>
    %24 = vector.extract_strided_slice %6 {offsets = [0, 40], sizes = [8, 8], strides = [1, 1]} : vector<8x68xf32> to vector<8x8xf32>
    %cst_10 = arith.constant dense<0.000000e+00> : vector<8x8xf32>
    %25 = tpu.matmul %23, %24, %cst_10 {dimension_numbers = #tpu.dot_dimension_numbers<[1], [1], [0], [0], [0, 0, 1, 0], [], []>} : vector<8x8xf32>, vector<8x8xf32>, vector<8x8xf32> -> vector<8x8xf32>
    %cst_11 = arith.constant dense<0xFF800000> : vector<8xf32>
    %26 = vector.multi_reduction <maximumf>, %25, %cst_11 [1] : vector<8x8xf32> to vector<8xf32>
    %27 = vector.shape_cast %26 : vector<8xf32> to vector<8x1xf32>
    %28 = vector.broadcast %27 : vector<8x1xf32> to vector<8x8xf32>
    %29 = arith.subf %25, %28 : vector<8x8xf32>
    %30 = math.exp %29 : vector<8x8xf32>
    %cst_12 = arith.constant dense<0.000000e+00> : vector<8xf32>
    %31 = vector.multi_reduction <add>, %30, %cst_12 [1] : vector<8x8xf32> to vector<8xf32>
    %32 = vector.shape_cast %31 : vector<8xf32> to vector<8x1xf32>
    %33 = vector.broadcast %32 : vector<8x1xf32> to vector<8x8xf32>
    %34 = arith.divf %30, %33 : vector<8x8xf32>
    %35 = vector.extract_strided_slice %6 {offsets = [0, 65], sizes = [8, 1], strides = [1, 1]} : vector<8x68xf32> to vector<8x1xf32>
    %cst_13 = arith.constant dense<0.000000e+00> : vector<8x1xf32>
    %36 = tpu.matmul %34, %35, %cst_13 {dimension_numbers = #tpu.dot_dimension_numbers<[1], [0], [0], [1], [0, 0, 1, 1], [], []>} : vector<8x8xf32>, vector<8x1xf32>, vector<8x1xf32> -> vector<8x1xf32>
    %37 = arith.addf %22, %36 : vector<8x1xf32>
    %38 = vector.extract_strided_slice %6 {offsets = [0, 16], sizes = [8, 8], strides = [1, 1]} : vector<8x68xf32> to vector<8x8xf32>
    %39 = vector.extract_strided_slice %6 {offsets = [0, 48], sizes = [8, 8], strides = [1, 1]} : vector<8x68xf32> to vector<8x8xf32>
    %cst_14 = arith.constant dense<0.000000e+00> : vector<8x8xf32>
    %40 = tpu.matmul %38, %39, %cst_14 {dimension_numbers = #tpu.dot_dimension_numbers<[1], [1], [0], [0], [0, 0, 1, 0], [], []>} : vector<8x8xf32>, vector<8x8xf32>, vector<8x8xf32> -> vector<8x8xf32>
    %cst_15 = arith.constant dense<0xFF800000> : vector<8xf32>
    %41 = vector.multi_reduction <maximumf>, %40, %cst_15 [1] : vector<8x8xf32> to vector<8xf32>
    %42 = vector.shape_cast %41 : vector<8xf32> to vector<8x1xf32>
    %43 = vector.broadcast %42 : vector<8x1xf32> to vector<8x8xf32>
    %44 = arith.subf %40, %43 : vector<8x8xf32>
    %45 = math.exp %44 : vector<8x8xf32>
    %cst_16 = arith.constant dense<0.000000e+00> : vector<8xf32>
    %46 = vector.multi_reduction <add>, %45, %cst_16 [1] : vector<8x8xf32> to vector<8xf32>
    %47 = vector.shape_cast %46 : vector<8xf32> to vector<8x1xf32>
    %48 = vector.broadcast %47 : vector<8x1xf32> to vector<8x8xf32>
    %49 = arith.divf %45, %48 : vector<8x8xf32>
    %50 = vector.extract_strided_slice %6 {offsets = [0, 66], sizes = [8, 1], strides = [1, 1]} : vector<8x68xf32> to vector<8x1xf32>
    %cst_17 = arith.constant dense<0.000000e+00> : vector<8x1xf32>
    %51 = tpu.matmul %49, %50, %cst_17 {dimension_numbers = #tpu.dot_dimension_numbers<[1], [0], [0], [1], [0, 0, 1, 1], [], []>} : vector<8x8xf32>, vector<8x1xf32>, vector<8x1xf32> -> vector<8x1xf32>
    %52 = arith.addf %37, %51 : vector<8x1xf32>
    %53 = vector.extract_strided_slice %6 {offsets = [0, 24], sizes = [8, 8], strides = [1, 1]} : vector<8x68xf32> to vector<8x8xf32>
    %54 = vector.extract_strided_slice %6 {offsets = [0, 56], sizes = [8, 8], strides = [1, 1]} : vector<8x68xf32> to vector<8x8xf32>
    %cst_18 = arith.constant dense<0.000000e+00> : vector<8x8xf32>
    %55 = tpu.matmul %53, %54, %cst_18 {dimension_numbers = #tpu.dot_dimension_numbers<[1], [1], [0], [0], [0, 0, 1, 0], [], []>} : vector<8x8xf32>, vector<8x8xf32>, vector<8x8xf32> -> vector<8x8xf32>
    %cst_19 = arith.constant dense<0xFF800000> : vector<8xf32>
    %56 = vector.multi_reduction <maximumf>, %55, %cst_19 [1] : vector<8x8xf32> to vector<8xf32>
    %57 = vector.shape_cast %56 : vector<8xf32> to vector<8x1xf32>
    %58 = vector.broadcast %57 : vector<8x1xf32> to vector<8x8xf32>
    %59 = arith.subf %55, %58 : vector<8x8xf32>
    %60 = math.exp %59 : vector<8x8xf32>
    %cst_20 = arith.constant dense<0.000000e+00> : vector<8xf32>
    %61 = vector.multi_reduction <add>, %60, %cst_20 [1] : vector<8x8xf32> to vector<8xf32>
    %62 = vector.shape_cast %61 : vector<8xf32> to vector<8x1xf32>
    %63 = vector.broadcast %62 : vector<8x1xf32> to vector<8x8xf32>
    %64 = arith.divf %60, %63 : vector<8x8xf32>
    %65 = vector.extract_strided_slice %6 {offsets = [0, 67], sizes = [8, 1], strides = [1, 1]} : vector<8x68xf32> to vector<8x1xf32>
    %cst_21 = arith.constant dense<0.000000e+00> : vector<8x1xf32>
    %66 = tpu.matmul %64, %65, %cst_21 {dimension_numbers = #tpu.dot_dimension_numbers<[1], [0], [0], [1], [0, 0, 1, 1], [], []>} : vector<8x8xf32>, vector<8x1xf32>, vector<8x1xf32> -> vector<8x1xf32>
    %67 = arith.addf %52, %66 : vector<8x1xf32>
    %68 = vector.extract_strided_slice %5 {offsets = [8, 0], sizes = [8, 68], strides = [1, 1]} : vector<48x68xf32> to vector<8x68xf32>
    %cst_22 = arith.constant 0.000000e+00 : f32
    %69 = vector.broadcast %cst_22 : f32 to vector<8x1xf32>
    %70 = vector.extract_strided_slice %68 {offsets = [0, 0], sizes = [8, 8], strides = [1, 1]} : vector<8x68xf32> to vector<8x8xf32>
    %71 = vector.extract_strided_slice %68 {offsets = [0, 32], sizes = [8, 8], strides = [1, 1]} : vector<8x68xf32> to vector<8x8xf32>
    %cst_23 = arith.constant dense<0.000000e+00> : vector<8x8xf32>
    %72 = tpu.matmul %70, %71, %cst_23 {dimension_numbers = #tpu.dot_dimension_numbers<[1], [1], [0], [0], [0, 0, 1, 0], [], []>} : vector<8x8xf32>, vector<8x8xf32>, vector<8x8xf32> -> vector<8x8xf32>
    %cst_24 = arith.constant dense<0xFF800000> : vector<8xf32>
    %73 = vector.multi_reduction <maximumf>, %72, %cst_24 [1] : vector<8x8xf32> to vector<8xf32>
    %74 = vector.shape_cast %73 : vector<8xf32> to vector<8x1xf32>
    %75 = vector.broadcast %74 : vector<8x1xf32> to vector<8x8xf32>
    %76 = arith.subf %72, %75 : vector<8x8xf32>
    %77 = math.exp %76 : vector<8x8xf32>
    %cst_25 = arith.constant dense<0.000000e+00> : vector<8xf32>
    %78 = vector.multi_reduction <add>, %77, %cst_25 [1] : vector<8x8xf32> to vector<8xf32>
    %79 = vector.shape_cast %78 : vector<8xf32> to vector<8x1xf32>
    %80 = vector.broadcast %79 : vector<8x1xf32> to vector<8x8xf32>
    %81 = arith.divf %77, %80 : vector<8x8xf32>
    %82 = vector.extract_strided_slice %68 {offsets = [0, 64], sizes = [8, 1], strides = [1, 1]} : vector<8x68xf32> to vector<8x1xf32>
    %cst_26 = arith.constant dense<0.000000e+00> : vector<8x1xf32>
    %83 = tpu.matmul %81, %82, %cst_26 {dimension_numbers = #tpu.dot_dimension_numbers<[1], [0], [0], [1], [0, 0, 1, 1], [], []>} : vector<8x8xf32>, vector<8x1xf32>, vector<8x1xf32> -> vector<8x1xf32>
    %84 = arith.addf %69, %83 : vector<8x1xf32>
    %85 = vector.extract_strided_slice %68 {offsets = [0, 8], sizes = [8, 8], strides = [1, 1]} : vector<8x68xf32> to vector<8x8xf32>
    %86 = vector.extract_strided_slice %68 {offsets = [0, 40], sizes = [8, 8], strides = [1, 1]} : vector<8x68xf32> to vector<8x8xf32>
    %cst_27 = arith.constant dense<0.000000e+00> : vector<8x8xf32>
    %87 = tpu.matmul %85, %86, %cst_27 {dimension_numbers = #tpu.dot_dimension_numbers<[1], [1], [0], [0], [0, 0, 1, 0], [], []>} : vector<8x8xf32>, vector<8x8xf32>, vector<8x8xf32> -> vector<8x8xf32>
    %cst_28 = arith.constant dense<0xFF800000> : vector<8xf32>
    %88 = vector.multi_reduction <maximumf>, %87, %cst_28 [1] : vector<8x8xf32> to vector<8xf32>
    %89 = vector.shape_cast %88 : vector<8xf32> to vector<8x1xf32>
    %90 = vector.broadcast %89 : vector<8x1xf32> to vector<8x8xf32>
    %91 = arith.subf %87, %90 : vector<8x8xf32>
    %92 = math.exp %91 : vector<8x8xf32>
    %cst_29 = arith.constant dense<0.000000e+00> : vector<8xf32>
    %93 = vector.multi_reduction <add>, %92, %cst_29 [1] : vector<8x8xf32> to vector<8xf32>
    %94 = vector.shape_cast %93 : vector<8xf32> to vector<8x1xf32>
    %95 = vector.broadcast %94 : vector<8x1xf32> to vector<8x8xf32>
    %96 = arith.divf %92, %95 : vector<8x8xf32>
    %97 = vector.extract_strided_slice %68 {offsets = [0, 65], sizes = [8, 1], strides = [1, 1]} : vector<8x68xf32> to vector<8x1xf32>
    %cst_30 = arith.constant dense<0.000000e+00> : vector<8x1xf32>
    %98 = tpu.matmul %96, %97, %cst_30 {dimension_numbers = #tpu.dot_dimension_numbers<[1], [0], [0], [1], [0, 0, 1, 1], [], []>} : vector<8x8xf32>, vector<8x1xf32>, vector<8x1xf32> -> vector<8x1xf32>
    %99 = arith.addf %84, %98 : vector<8x1xf32>
    %100 = vector.extract_strided_slice %68 {offsets = [0, 16], sizes = [8, 8], strides = [1, 1]} : vector<8x68xf32> to vector<8x8xf32>
    %101 = vector.extract_strided_slice %68 {offsets = [0, 48], sizes = [8, 8], strides = [1, 1]} : vector<8x68xf32> to vector<8x8xf32>
    %cst_31 = arith.constant dense<0.000000e+00> : vector<8x8xf32>
    %102 = tpu.matmul %100, %101, %cst_31 {dimension_numbers = #tpu.dot_dimension_numbers<[1], [1], [0], [0], [0, 0, 1, 0], [], []>} : vector<8x8xf32>, vector<8x8xf32>, vector<8x8xf32> -> vector<8x8xf32>
    %cst_32 = arith.constant dense<0xFF800000> : vector<8xf32>
    %103 = vector.multi_reduction <maximumf>, %102, %cst_32 [1] : vector<8x8xf32> to vector<8xf32>
    %104 = vector.shape_cast %103 : vector<8xf32> to vector<8x1xf32>
    %105 = vector.broadcast %104 : vector<8x1xf32> to vector<8x8xf32>
    %106 = arith.subf %102, %105 : vector<8x8xf32>
    %107 = math.exp %106 : vector<8x8xf32>
    %cst_33 = arith.constant dense<0.000000e+00> : vector<8xf32>
    %108 = vector.multi_reduction <add>, %107, %cst_33 [1] : vector<8x8xf32> to vector<8xf32>
    %109 = vector.shape_cast %108 : vector<8xf32> to vector<8x1xf32>
    %110 = vector.broadcast %109 : vector<8x1xf32> to vector<8x8xf32>
    %111 = arith.divf %107, %110 : vector<8x8xf32>
    %112 = vector.extract_strided_slice %68 {offsets = [0, 66], sizes = [8, 1], strides = [1, 1]} : vector<8x68xf32> to vector<8x1xf32>
    %cst_34 = arith.constant dense<0.000000e+00> : vector<8x1xf32>
    %113 = tpu.matmul %111, %112, %cst_34 {dimension_numbers = #tpu.dot_dimension_numbers<[1], [0], [0], [1], [0, 0, 1, 1], [], []>} : vector<8x8xf32>, vector<8x1xf32>, vector<8x1xf32> -> vector<8x1xf32>
    %114 = arith.addf %99, %113 : vector<8x1xf32>
    %115 = vector.extract_strided_slice %68 {offsets = [0, 24], sizes = [8, 8], strides = [1, 1]} : vector<8x68xf32> to vector<8x8xf32>
    %116 = vector.extract_strided_slice %68 {offsets = [0, 56], sizes = [8, 8], strides = [1, 1]} : vector<8x68xf32> to vector<8x8xf32>
    %cst_35 = arith.constant dense<0.000000e+00> : vector<8x8xf32>
    %117 = tpu.matmul %115, %116, %cst_35 {dimension_numbers = #tpu.dot_dimension_numbers<[1], [1], [0], [0], [0, 0, 1, 0], [], []>} : vector<8x8xf32>, vector<8x8xf32>, vector<8x8xf32> -> vector<8x8xf32>
    %cst_36 = arith.constant dense<0xFF800000> : vector<8xf32>
    %118 = vector.multi_reduction <maximumf>, %117, %cst_36 [1] : vector<8x8xf32> to vector<8xf32>
    %119 = vector.shape_cast %118 : vector<8xf32> to vector<8x1xf32>
    %120 = vector.broadcast %119 : vector<8x1xf32> to vector<8x8xf32>
    %121 = arith.subf %117, %120 : vector<8x8xf32>
    %122 = math.exp %121 : vector<8x8xf32>
    %cst_37 = arith.constant dense<0.000000e+00> : vector<8xf32>
    %123 = vector.multi_reduction <add>, %122, %cst_37 [1] : vector<8x8xf32> to vector<8xf32>
    %124 = vector.shape_cast %123 : vector<8xf32> to vector<8x1xf32>
    %125 = vector.broadcast %124 : vector<8x1xf32> to vector<8x8xf32>
    %126 = arith.divf %122, %125 : vector<8x8xf32>
    %127 = vector.extract_strided_slice %68 {offsets = [0, 67], sizes = [8, 1], strides = [1, 1]} : vector<8x68xf32> to vector<8x1xf32>
    %cst_38 = arith.constant dense<0.000000e+00> : vector<8x1xf32>
    %128 = tpu.matmul %126, %127, %cst_38 {dimension_numbers = #tpu.dot_dimension_numbers<[1], [0], [0], [1], [0, 0, 1, 1], [], []>} : vector<8x8xf32>, vector<8x1xf32>, vector<8x1xf32> -> vector<8x1xf32>
    %129 = arith.addf %114, %128 : vector<8x1xf32>
    %130 = vector.extract_strided_slice %5 {offsets = [16, 0], sizes = [8, 68], strides = [1, 1]} : vector<48x68xf32> to vector<8x68xf32>
    %cst_39 = arith.constant 0.000000e+00 : f32
    %131 = vector.broadcast %cst_39 : f32 to vector<8x1xf32>
    %132 = vector.extract_strided_slice %130 {offsets = [0, 0], sizes = [8, 8], strides = [1, 1]} : vector<8x68xf32> to vector<8x8xf32>
    %133 = vector.extract_strided_slice %130 {offsets = [0, 32], sizes = [8, 8], strides = [1, 1]} : vector<8x68xf32> to vector<8x8xf32>
    %cst_40 = arith.constant dense<0.000000e+00> : vector<8x8xf32>
    %134 = tpu.matmul %132, %133, %cst_40 {dimension_numbers = #tpu.dot_dimension_numbers<[1], [1], [0], [0], [0, 0, 1, 0], [], []>} : vector<8x8xf32>, vector<8x8xf32>, vector<8x8xf32> -> vector<8x8xf32>
    %cst_41 = arith.constant dense<0xFF800000> : vector<8xf32>
    %135 = vector.multi_reduction <maximumf>, %134, %cst_41 [1] : vector<8x8xf32> to vector<8xf32>
    %136 = vector.shape_cast %135 : vector<8xf32> to vector<8x1xf32>
    %137 = vector.broadcast %136 : vector<8x1xf32> to vector<8x8xf32>
    %138 = arith.subf %134, %137 : vector<8x8xf32>
    %139 = math.exp %138 : vector<8x8xf32>
    %cst_42 = arith.constant dense<0.000000e+00> : vector<8xf32>
    %140 = vector.multi_reduction <add>, %139, %cst_42 [1] : vector<8x8xf32> to vector<8xf32>
    %141 = vector.shape_cast %140 : vector<8xf32> to vector<8x1xf32>
    %142 = vector.broadcast %141 : vector<8x1xf32> to vector<8x8xf32>
    %143 = arith.divf %139, %142 : vector<8x8xf32>
    %144 = vector.extract_strided_slice %130 {offsets = [0, 64], sizes = [8, 1], strides = [1, 1]} : vector<8x68xf32> to vector<8x1xf32>
    %cst_43 = arith.constant dense<0.000000e+00> : vector<8x1xf32>
    %145 = tpu.matmul %143, %144, %cst_43 {dimension_numbers = #tpu.dot_dimension_numbers<[1], [0], [0], [1], [0, 0, 1, 1], [], []>} : vector<8x8xf32>, vector<8x1xf32>, vector<8x1xf32> -> vector<8x1xf32>
    %146 = arith.addf %131, %145 : vector<8x1xf32>
    %147 = vector.extract_strided_slice %130 {offsets = [0, 8], sizes = [8, 8], strides = [1, 1]} : vector<8x68xf32> to vector<8x8xf32>
    %148 = vector.extract_strided_slice %130 {offsets = [0, 40], sizes = [8, 8], strides = [1, 1]} : vector<8x68xf32> to vector<8x8xf32>
    %cst_44 = arith.constant dense<0.000000e+00> : vector<8x8xf32>
    %149 = tpu.matmul %147, %148, %cst_44 {dimension_numbers = #tpu.dot_dimension_numbers<[1], [1], [0], [0], [0, 0, 1, 0], [], []>} : vector<8x8xf32>, vector<8x8xf32>, vector<8x8xf32> -> vector<8x8xf32>
    %cst_45 = arith.constant dense<0xFF800000> : vector<8xf32>
    %150 = vector.multi_reduction <maximumf>, %149, %cst_45 [1] : vector<8x8xf32> to vector<8xf32>
    %151 = vector.shape_cast %150 : vector<8xf32> to vector<8x1xf32>
    %152 = vector.broadcast %151 : vector<8x1xf32> to vector<8x8xf32>
    %153 = arith.subf %149, %152 : vector<8x8xf32>
    %154 = math.exp %153 : vector<8x8xf32>
    %cst_46 = arith.constant dense<0.000000e+00> : vector<8xf32>
    %155 = vector.multi_reduction <add>, %154, %cst_46 [1] : vector<8x8xf32> to vector<8xf32>
    %156 = vector.shape_cast %155 : vector<8xf32> to vector<8x1xf32>
    %157 = vector.broadcast %156 : vector<8x1xf32> to vector<8x8xf32>
    %158 = arith.divf %154, %157 : vector<8x8xf32>
    %159 = vector.extract_strided_slice %130 {offsets = [0, 65], sizes = [8, 1], strides = [1, 1]} : vector<8x68xf32> to vector<8x1xf32>
    %cst_47 = arith.constant dense<0.000000e+00> : vector<8x1xf32>
    %160 = tpu.matmul %158, %159, %cst_47 {dimension_numbers = #tpu.dot_dimension_numbers<[1], [0], [0], [1], [0, 0, 1, 1], [], []>} : vector<8x8xf32>, vector<8x1xf32>, vector<8x1xf32> -> vector<8x1xf32>
    %161 = arith.addf %146, %160 : vector<8x1xf32>
    %162 = vector.extract_strided_slice %130 {offsets = [0, 16], sizes = [8, 8], strides = [1, 1]} : vector<8x68xf32> to vector<8x8xf32>
    %163 = vector.extract_strided_slice %130 {offsets = [0, 48], sizes = [8, 8], strides = [1, 1]} : vector<8x68xf32> to vector<8x8xf32>
    %cst_48 = arith.constant dense<0.000000e+00> : vector<8x8xf32>
    %164 = tpu.matmul %162, %163, %cst_48 {dimension_numbers = #tpu.dot_dimension_numbers<[1], [1], [0], [0], [0, 0, 1, 0], [], []>} : vector<8x8xf32>, vector<8x8xf32>, vector<8x8xf32> -> vector<8x8xf32>
    %cst_49 = arith.constant dense<0xFF800000> : vector<8xf32>
    %165 = vector.multi_reduction <maximumf>, %164, %cst_49 [1] : vector<8x8xf32> to vector<8xf32>
    %166 = vector.shape_cast %165 : vector<8xf32> to vector<8x1xf32>
    %167 = vector.broadcast %166 : vector<8x1xf32> to vector<8x8xf32>
    %168 = arith.subf %164, %167 : vector<8x8xf32>
    %169 = math.exp %168 : vector<8x8xf32>
    %cst_50 = arith.constant dense<0.000000e+00> : vector<8xf32>
    %170 = vector.multi_reduction <add>, %169, %cst_50 [1] : vector<8x8xf32> to vector<8xf32>
    %171 = vector.shape_cast %170 : vector<8xf32> to vector<8x1xf32>
    %172 = vector.broadcast %171 : vector<8x1xf32> to vector<8x8xf32>
    %173 = arith.divf %169, %172 : vector<8x8xf32>
    %174 = vector.extract_strided_slice %130 {offsets = [0, 66], sizes = [8, 1], strides = [1, 1]} : vector<8x68xf32> to vector<8x1xf32>
    %cst_51 = arith.constant dense<0.000000e+00> : vector<8x1xf32>
    %175 = tpu.matmul %173, %174, %cst_51 {dimension_numbers = #tpu.dot_dimension_numbers<[1], [0], [0], [1], [0, 0, 1, 1], [], []>} : vector<8x8xf32>, vector<8x1xf32>, vector<8x1xf32> -> vector<8x1xf32>
    %176 = arith.addf %161, %175 : vector<8x1xf32>
    %177 = vector.extract_strided_slice %130 {offsets = [0, 24], sizes = [8, 8], strides = [1, 1]} : vector<8x68xf32> to vector<8x8xf32>
    %178 = vector.extract_strided_slice %130 {offsets = [0, 56], sizes = [8, 8], strides = [1, 1]} : vector<8x68xf32> to vector<8x8xf32>
    %cst_52 = arith.constant dense<0.000000e+00> : vector<8x8xf32>
    %179 = tpu.matmul %177, %178, %cst_52 {dimension_numbers = #tpu.dot_dimension_numbers<[1], [1], [0], [0], [0, 0, 1, 0], [], []>} : vector<8x8xf32>, vector<8x8xf32>, vector<8x8xf32> -> vector<8x8xf32>
    %cst_53 = arith.constant dense<0xFF800000> : vector<8xf32>
    %180 = vector.multi_reduction <maximumf>, %179, %cst_53 [1] : vector<8x8xf32> to vector<8xf32>
    %181 = vector.shape_cast %180 : vector<8xf32> to vector<8x1xf32>
    %182 = vector.broadcast %181 : vector<8x1xf32> to vector<8x8xf32>
    %183 = arith.subf %179, %182 : vector<8x8xf32>
    %184 = math.exp %183 : vector<8x8xf32>
    %cst_54 = arith.constant dense<0.000000e+00> : vector<8xf32>
    %185 = vector.multi_reduction <add>, %184, %cst_54 [1] : vector<8x8xf32> to vector<8xf32>
    %186 = vector.shape_cast %185 : vector<8xf32> to vector<8x1xf32>
    %187 = vector.broadcast %186 : vector<8x1xf32> to vector<8x8xf32>
    %188 = arith.divf %184, %187 : vector<8x8xf32>
    %189 = vector.extract_strided_slice %130 {offsets = [0, 67], sizes = [8, 1], strides = [1, 1]} : vector<8x68xf32> to vector<8x1xf32>
    %cst_55 = arith.constant dense<0.000000e+00> : vector<8x1xf32>
    %190 = tpu.matmul %188, %189, %cst_55 {dimension_numbers = #tpu.dot_dimension_numbers<[1], [0], [0], [1], [0, 0, 1, 1], [], []>} : vector<8x8xf32>, vector<8x1xf32>, vector<8x1xf32> -> vector<8x1xf32>
    %191 = arith.addf %176, %190 : vector<8x1xf32>
    %192 = vector.extract_strided_slice %5 {offsets = [24, 0], sizes = [8, 68], strides = [1, 1]} : vector<48x68xf32> to vector<8x68xf32>
    %cst_56 = arith.constant 0.000000e+00 : f32
    %193 = vector.broadcast %cst_56 : f32 to vector<8x1xf32>
    %194 = vector.extract_strided_slice %192 {offsets = [0, 0], sizes = [8, 8], strides = [1, 1]} : vector<8x68xf32> to vector<8x8xf32>
    %195 = vector.extract_strided_slice %192 {offsets = [0, 32], sizes = [8, 8], strides = [1, 1]} : vector<8x68xf32> to vector<8x8xf32>
    %cst_57 = arith.constant dense<0.000000e+00> : vector<8x8xf32>
    %196 = tpu.matmul %194, %195, %cst_57 {dimension_numbers = #tpu.dot_dimension_numbers<[1], [1], [0], [0], [0, 0, 1, 0], [], []>} : vector<8x8xf32>, vector<8x8xf32>, vector<8x8xf32> -> vector<8x8xf32>
    %cst_58 = arith.constant dense<0xFF800000> : vector<8xf32>
    %197 = vector.multi_reduction <maximumf>, %196, %cst_58 [1] : vector<8x8xf32> to vector<8xf32>
    %198 = vector.shape_cast %197 : vector<8xf32> to vector<8x1xf32>
    %199 = vector.broadcast %198 : vector<8x1xf32> to vector<8x8xf32>
    %200 = arith.subf %196, %199 : vector<8x8xf32>
    %201 = math.exp %200 : vector<8x8xf32>
    %cst_59 = arith.constant dense<0.000000e+00> : vector<8xf32>
    %202 = vector.multi_reduction <add>, %201, %cst_59 [1] : vector<8x8xf32> to vector<8xf32>
    %203 = vector.shape_cast %202 : vector<8xf32> to vector<8x1xf32>
    %204 = vector.broadcast %203 : vector<8x1xf32> to vector<8x8xf32>
    %205 = arith.divf %201, %204 : vector<8x8xf32>
    %206 = vector.extract_strided_slice %192 {offsets = [0, 64], sizes = [8, 1], strides = [1, 1]} : vector<8x68xf32> to vector<8x1xf32>
    %cst_60 = arith.constant dense<0.000000e+00> : vector<8x1xf32>
    %207 = tpu.matmul %205, %206, %cst_60 {dimension_numbers = #tpu.dot_dimension_numbers<[1], [0], [0], [1], [0, 0, 1, 1], [], []>} : vector<8x8xf32>, vector<8x1xf32>, vector<8x1xf32> -> vector<8x1xf32>
    %208 = arith.addf %193, %207 : vector<8x1xf32>
    %209 = vector.extract_strided_slice %192 {offsets = [0, 8], sizes = [8, 8], strides = [1, 1]} : vector<8x68xf32> to vector<8x8xf32>
    %210 = vector.extract_strided_slice %192 {offsets = [0, 40], sizes = [8, 8], strides = [1, 1]} : vector<8x68xf32> to vector<8x8xf32>
    %cst_61 = arith.constant dense<0.000000e+00> : vector<8x8xf32>
    %211 = tpu.matmul %209, %210, %cst_61 {dimension_numbers = #tpu.dot_dimension_numbers<[1], [1], [0], [0], [0, 0, 1, 0], [], []>} : vector<8x8xf32>, vector<8x8xf32>, vector<8x8xf32> -> vector<8x8xf32>
    %cst_62 = arith.constant dense<0xFF800000> : vector<8xf32>
    %212 = vector.multi_reduction <maximumf>, %211, %cst_62 [1] : vector<8x8xf32> to vector<8xf32>
    %213 = vector.shape_cast %212 : vector<8xf32> to vector<8x1xf32>
    %214 = vector.broadcast %213 : vector<8x1xf32> to vector<8x8xf32>
    %215 = arith.subf %211, %214 : vector<8x8xf32>
    %216 = math.exp %215 : vector<8x8xf32>
    %cst_63 = arith.constant dense<0.000000e+00> : vector<8xf32>
    %217 = vector.multi_reduction <add>, %216, %cst_63 [1] : vector<8x8xf32> to vector<8xf32>
    %218 = vector.shape_cast %217 : vector<8xf32> to vector<8x1xf32>
    %219 = vector.broadcast %218 : vector<8x1xf32> to vector<8x8xf32>
    %220 = arith.divf %216, %219 : vector<8x8xf32>
    %221 = vector.extract_strided_slice %192 {offsets = [0, 65], sizes = [8, 1], strides = [1, 1]} : vector<8x68xf32> to vector<8x1xf32>
    %cst_64 = arith.constant dense<0.000000e+00> : vector<8x1xf32>
    %222 = tpu.matmul %220, %221, %cst_64 {dimension_numbers = #tpu.dot_dimension_numbers<[1], [0], [0], [1], [0, 0, 1, 1], [], []>} : vector<8x8xf32>, vector<8x1xf32>, vector<8x1xf32> -> vector<8x1xf32>
    %223 = arith.addf %208, %222 : vector<8x1xf32>
    %224 = vector.extract_strided_slice %192 {offsets = [0, 16], sizes = [8, 8], strides = [1, 1]} : vector<8x68xf32> to vector<8x8xf32>
    %225 = vector.extract_strided_slice %192 {offsets = [0, 48], sizes = [8, 8], strides = [1, 1]} : vector<8x68xf32> to vector<8x8xf32>
    %cst_65 = arith.constant dense<0.000000e+00> : vector<8x8xf32>
    %226 = tpu.matmul %224, %225, %cst_65 {dimension_numbers = #tpu.dot_dimension_numbers<[1], [1], [0], [0], [0, 0, 1, 0], [], []>} : vector<8x8xf32>, vector<8x8xf32>, vector<8x8xf32> -> vector<8x8xf32>
    %cst_66 = arith.constant dense<0xFF800000> : vector<8xf32>
    %227 = vector.multi_reduction <maximumf>, %226, %cst_66 [1] : vector<8x8xf32> to vector<8xf32>
    %228 = vector.shape_cast %227 : vector<8xf32> to vector<8x1xf32>
    %229 = vector.broadcast %228 : vector<8x1xf32> to vector<8x8xf32>
    %230 = arith.subf %226, %229 : vector<8x8xf32>
    %231 = math.exp %230 : vector<8x8xf32>
    %cst_67 = arith.constant dense<0.000000e+00> : vector<8xf32>
    %232 = vector.multi_reduction <add>, %231, %cst_67 [1] : vector<8x8xf32> to vector<8xf32>
    %233 = vector.shape_cast %232 : vector<8xf32> to vector<8x1xf32>
    %234 = vector.broadcast %233 : vector<8x1xf32> to vector<8x8xf32>
    %235 = arith.divf %231, %234 : vector<8x8xf32>
    %236 = vector.extract_strided_slice %192 {offsets = [0, 66], sizes = [8, 1], strides = [1, 1]} : vector<8x68xf32> to vector<8x1xf32>
    %cst_68 = arith.constant dense<0.000000e+00> : vector<8x1xf32>
    %237 = tpu.matmul %235, %236, %cst_68 {dimension_numbers = #tpu.dot_dimension_numbers<[1], [0], [0], [1], [0, 0, 1, 1], [], []>} : vector<8x8xf32>, vector<8x1xf32>, vector<8x1xf32> -> vector<8x1xf32>
    %238 = arith.addf %223, %237 : vector<8x1xf32>
    %239 = vector.extract_strided_slice %192 {offsets = [0, 24], sizes = [8, 8], strides = [1, 1]} : vector<8x68xf32> to vector<8x8xf32>
    %240 = vector.extract_strided_slice %192 {offsets = [0, 56], sizes = [8, 8], strides = [1, 1]} : vector<8x68xf32> to vector<8x8xf32>
    %cst_69 = arith.constant dense<0.000000e+00> : vector<8x8xf32>
    %241 = tpu.matmul %239, %240, %cst_69 {dimension_numbers = #tpu.dot_dimension_numbers<[1], [1], [0], [0], [0, 0, 1, 0], [], []>} : vector<8x8xf32>, vector<8x8xf32>, vector<8x8xf32> -> vector<8x8xf32>
    %cst_70 = arith.constant dense<0xFF800000> : vector<8xf32>
    %242 = vector.multi_reduction <maximumf>, %241, %cst_70 [1] : vector<8x8xf32> to vector<8xf32>
    %243 = vector.shape_cast %242 : vector<8xf32> to vector<8x1xf32>
    %244 = vector.broadcast %243 : vector<8x1xf32> to vector<8x8xf32>
    %245 = arith.subf %241, %244 : vector<8x8xf32>
    %246 = math.exp %245 : vector<8x8xf32>
    %cst_71 = arith.constant dense<0.000000e+00> : vector<8xf32>
    %247 = vector.multi_reduction <add>, %246, %cst_71 [1] : vector<8x8xf32> to vector<8xf32>
    %248 = vector.shape_cast %247 : vector<8xf32> to vector<8x1xf32>
    %249 = vector.broadcast %248 : vector<8x1xf32> to vector<8x8xf32>
    %250 = arith.divf %246, %249 : vector<8x8xf32>
    %251 = vector.extract_strided_slice %192 {offsets = [0, 67], sizes = [8, 1], strides = [1, 1]} : vector<8x68xf32> to vector<8x1xf32>
    %cst_72 = arith.constant dense<0.000000e+00> : vector<8x1xf32>
    %252 = tpu.matmul %250, %251, %cst_72 {dimension_numbers = #tpu.dot_dimension_numbers<[1], [0], [0], [1], [0, 0, 1, 1], [], []>} : vector<8x8xf32>, vector<8x1xf32>, vector<8x1xf32> -> vector<8x1xf32>
    %253 = arith.addf %238, %252 : vector<8x1xf32>
    %254 = vector.extract_strided_slice %5 {offsets = [32, 0], sizes = [8, 68], strides = [1, 1]} : vector<48x68xf32> to vector<8x68xf32>
    %cst_73 = arith.constant 0.000000e+00 : f32
    %255 = vector.broadcast %cst_73 : f32 to vector<8x1xf32>
    %256 = vector.extract_strided_slice %254 {offsets = [0, 0], sizes = [8, 8], strides = [1, 1]} : vector<8x68xf32> to vector<8x8xf32>
    %257 = vector.extract_strided_slice %254 {offsets = [0, 32], sizes = [8, 8], strides = [1, 1]} : vector<8x68xf32> to vector<8x8xf32>
    %cst_74 = arith.constant dense<0.000000e+00> : vector<8x8xf32>
    %258 = tpu.matmul %256, %257, %cst_74 {dimension_numbers = #tpu.dot_dimension_numbers<[1], [1], [0], [0], [0, 0, 1, 0], [], []>} : vector<8x8xf32>, vector<8x8xf32>, vector<8x8xf32> -> vector<8x8xf32>
    %cst_75 = arith.constant dense<0xFF800000> : vector<8xf32>
    %259 = vector.multi_reduction <maximumf>, %258, %cst_75 [1] : vector<8x8xf32> to vector<8xf32>
    %260 = vector.shape_cast %259 : vector<8xf32> to vector<8x1xf32>
    %261 = vector.broadcast %260 : vector<8x1xf32> to vector<8x8xf32>
    %262 = arith.subf %258, %261 : vector<8x8xf32>
    %263 = math.exp %262 : vector<8x8xf32>
    %cst_76 = arith.constant dense<0.000000e+00> : vector<8xf32>
    %264 = vector.multi_reduction <add>, %263, %cst_76 [1] : vector<8x8xf32> to vector<8xf32>
    %265 = vector.shape_cast %264 : vector<8xf32> to vector<8x1xf32>
    %266 = vector.broadcast %265 : vector<8x1xf32> to vector<8x8xf32>
    %267 = arith.divf %263, %266 : vector<8x8xf32>
    %268 = vector.extract_strided_slice %254 {offsets = [0, 64], sizes = [8, 1], strides = [1, 1]} : vector<8x68xf32> to vector<8x1xf32>
    %cst_77 = arith.constant dense<0.000000e+00> : vector<8x1xf32>
    %269 = tpu.matmul %267, %268, %cst_77 {dimension_numbers = #tpu.dot_dimension_numbers<[1], [0], [0], [1], [0, 0, 1, 1], [], []>} : vector<8x8xf32>, vector<8x1xf32>, vector<8x1xf32> -> vector<8x1xf32>
    %270 = arith.addf %255, %269 : vector<8x1xf32>
    %271 = vector.extract_strided_slice %254 {offsets = [0, 8], sizes = [8, 8], strides = [1, 1]} : vector<8x68xf32> to vector<8x8xf32>
    %272 = vector.extract_strided_slice %254 {offsets = [0, 40], sizes = [8, 8], strides = [1, 1]} : vector<8x68xf32> to vector<8x8xf32>
    %cst_78 = arith.constant dense<0.000000e+00> : vector<8x8xf32>
    %273 = tpu.matmul %271, %272, %cst_78 {dimension_numbers = #tpu.dot_dimension_numbers<[1], [1], [0], [0], [0, 0, 1, 0], [], []>} : vector<8x8xf32>, vector<8x8xf32>, vector<8x8xf32> -> vector<8x8xf32>
    %cst_79 = arith.constant dense<0xFF800000> : vector<8xf32>
    %274 = vector.multi_reduction <maximumf>, %273, %cst_79 [1] : vector<8x8xf32> to vector<8xf32>
    %275 = vector.shape_cast %274 : vector<8xf32> to vector<8x1xf32>
    %276 = vector.broadcast %275 : vector<8x1xf32> to vector<8x8xf32>
    %277 = arith.subf %273, %276 : vector<8x8xf32>
    %278 = math.exp %277 : vector<8x8xf32>
    %cst_80 = arith.constant dense<0.000000e+00> : vector<8xf32>
    %279 = vector.multi_reduction <add>, %278, %cst_80 [1] : vector<8x8xf32> to vector<8xf32>
    %280 = vector.shape_cast %279 : vector<8xf32> to vector<8x1xf32>
    %281 = vector.broadcast %280 : vector<8x1xf32> to vector<8x8xf32>
    %282 = arith.divf %278, %281 : vector<8x8xf32>
    %283 = vector.extract_strided_slice %254 {offsets = [0, 65], sizes = [8, 1], strides = [1, 1]} : vector<8x68xf32> to vector<8x1xf32>
    %cst_81 = arith.constant dense<0.000000e+00> : vector<8x1xf32>
    %284 = tpu.matmul %282, %283, %cst_81 {dimension_numbers = #tpu.dot_dimension_numbers<[1], [0], [0], [1], [0, 0, 1, 1], [], []>} : vector<8x8xf32>, vector<8x1xf32>, vector<8x1xf32> -> vector<8x1xf32>
    %285 = arith.addf %270, %284 : vector<8x1xf32>
    %286 = vector.extract_strided_slice %254 {offsets = [0, 16], sizes = [8, 8], strides = [1, 1]} : vector<8x68xf32> to vector<8x8xf32>
    %287 = vector.extract_strided_slice %254 {offsets = [0, 48], sizes = [8, 8], strides = [1, 1]} : vector<8x68xf32> to vector<8x8xf32>
    %cst_82 = arith.constant dense<0.000000e+00> : vector<8x8xf32>
    %288 = tpu.matmul %286, %287, %cst_82 {dimension_numbers = #tpu.dot_dimension_numbers<[1], [1], [0], [0], [0, 0, 1, 0], [], []>} : vector<8x8xf32>, vector<8x8xf32>, vector<8x8xf32> -> vector<8x8xf32>
    %cst_83 = arith.constant dense<0xFF800000> : vector<8xf32>
    %289 = vector.multi_reduction <maximumf>, %288, %cst_83 [1] : vector<8x8xf32> to vector<8xf32>
    %290 = vector.shape_cast %289 : vector<8xf32> to vector<8x1xf32>
    %291 = vector.broadcast %290 : vector<8x1xf32> to vector<8x8xf32>
    %292 = arith.subf %288, %291 : vector<8x8xf32>
    %293 = math.exp %292 : vector<8x8xf32>
    %cst_84 = arith.constant dense<0.000000e+00> : vector<8xf32>
    %294 = vector.multi_reduction <add>, %293, %cst_84 [1] : vector<8x8xf32> to vector<8xf32>
    %295 = vector.shape_cast %294 : vector<8xf32> to vector<8x1xf32>
    %296 = vector.broadcast %295 : vector<8x1xf32> to vector<8x8xf32>
    %297 = arith.divf %293, %296 : vector<8x8xf32>
    %298 = vector.extract_strided_slice %254 {offsets = [0, 66], sizes = [8, 1], strides = [1, 1]} : vector<8x68xf32> to vector<8x1xf32>
    %cst_85 = arith.constant dense<0.000000e+00> : vector<8x1xf32>
    %299 = tpu.matmul %297, %298, %cst_85 {dimension_numbers = #tpu.dot_dimension_numbers<[1], [0], [0], [1], [0, 0, 1, 1], [], []>} : vector<8x8xf32>, vector<8x1xf32>, vector<8x1xf32> -> vector<8x1xf32>
    %300 = arith.addf %285, %299 : vector<8x1xf32>
    %301 = vector.extract_strided_slice %254 {offsets = [0, 24], sizes = [8, 8], strides = [1, 1]} : vector<8x68xf32> to vector<8x8xf32>
    %302 = vector.extract_strided_slice %254 {offsets = [0, 56], sizes = [8, 8], strides = [1, 1]} : vector<8x68xf32> to vector<8x8xf32>
    %cst_86 = arith.constant dense<0.000000e+00> : vector<8x8xf32>
    %303 = tpu.matmul %301, %302, %cst_86 {dimension_numbers = #tpu.dot_dimension_numbers<[1], [1], [0], [0], [0, 0, 1, 0], [], []>} : vector<8x8xf32>, vector<8x8xf32>, vector<8x8xf32> -> vector<8x8xf32>
    %cst_87 = arith.constant dense<0xFF800000> : vector<8xf32>
    %304 = vector.multi_reduction <maximumf>, %303, %cst_87 [1] : vector<8x8xf32> to vector<8xf32>
    %305 = vector.shape_cast %304 : vector<8xf32> to vector<8x1xf32>
    %306 = vector.broadcast %305 : vector<8x1xf32> to vector<8x8xf32>
    %307 = arith.subf %303, %306 : vector<8x8xf32>
    %308 = math.exp %307 : vector<8x8xf32>
    %cst_88 = arith.constant dense<0.000000e+00> : vector<8xf32>
    %309 = vector.multi_reduction <add>, %308, %cst_88 [1] : vector<8x8xf32> to vector<8xf32>
    %310 = vector.shape_cast %309 : vector<8xf32> to vector<8x1xf32>
    %311 = vector.broadcast %310 : vector<8x1xf32> to vector<8x8xf32>
    %312 = arith.divf %308, %311 : vector<8x8xf32>
    %313 = vector.extract_strided_slice %254 {offsets = [0, 67], sizes = [8, 1], strides = [1, 1]} : vector<8x68xf32> to vector<8x1xf32>
    %cst_89 = arith.constant dense<0.000000e+00> : vector<8x1xf32>
    %314 = tpu.matmul %312, %313, %cst_89 {dimension_numbers = #tpu.dot_dimension_numbers<[1], [0], [0], [1], [0, 0, 1, 1], [], []>} : vector<8x8xf32>, vector<8x1xf32>, vector<8x1xf32> -> vector<8x1xf32>
    %315 = arith.addf %300, %314 : vector<8x1xf32>
    %316 = vector.extract_strided_slice %5 {offsets = [40, 0], sizes = [8, 68], strides = [1, 1]} : vector<48x68xf32> to vector<8x68xf32>
    %cst_90 = arith.constant 0.000000e+00 : f32
    %317 = vector.broadcast %cst_90 : f32 to vector<8x1xf32>
    %318 = vector.extract_strided_slice %316 {offsets = [0, 0], sizes = [8, 8], strides = [1, 1]} : vector<8x68xf32> to vector<8x8xf32>
    %319 = vector.extract_strided_slice %316 {offsets = [0, 32], sizes = [8, 8], strides = [1, 1]} : vector<8x68xf32> to vector<8x8xf32>
    %cst_91 = arith.constant dense<0.000000e+00> : vector<8x8xf32>
    %320 = tpu.matmul %318, %319, %cst_91 {dimension_numbers = #tpu.dot_dimension_numbers<[1], [1], [0], [0], [0, 0, 1, 0], [], []>} : vector<8x8xf32>, vector<8x8xf32>, vector<8x8xf32> -> vector<8x8xf32>
    %cst_92 = arith.constant dense<0xFF800000> : vector<8xf32>
    %321 = vector.multi_reduction <maximumf>, %320, %cst_92 [1] : vector<8x8xf32> to vector<8xf32>
    %322 = vector.shape_cast %321 : vector<8xf32> to vector<8x1xf32>
    %323 = vector.broadcast %322 : vector<8x1xf32> to vector<8x8xf32>
    %324 = arith.subf %320, %323 : vector<8x8xf32>
    %325 = math.exp %324 : vector<8x8xf32>
    %cst_93 = arith.constant dense<0.000000e+00> : vector<8xf32>
    %326 = vector.multi_reduction <add>, %325, %cst_93 [1] : vector<8x8xf32> to vector<8xf32>
    %327 = vector.shape_cast %326 : vector<8xf32> to vector<8x1xf32>
    %328 = vector.broadcast %327 : vector<8x1xf32> to vector<8x8xf32>
    %329 = arith.divf %325, %328 : vector<8x8xf32>
    %330 = vector.extract_strided_slice %316 {offsets = [0, 64], sizes = [8, 1], strides = [1, 1]} : vector<8x68xf32> to vector<8x1xf32>
    %cst_94 = arith.constant dense<0.000000e+00> : vector<8x1xf32>
    %331 = tpu.matmul %329, %330, %cst_94 {dimension_numbers = #tpu.dot_dimension_numbers<[1], [0], [0], [1], [0, 0, 1, 1], [], []>} : vector<8x8xf32>, vector<8x1xf32>, vector<8x1xf32> -> vector<8x1xf32>
    %332 = arith.addf %317, %331 : vector<8x1xf32>
    %333 = vector.extract_strided_slice %316 {offsets = [0, 8], sizes = [8, 8], strides = [1, 1]} : vector<8x68xf32> to vector<8x8xf32>
    %334 = vector.extract_strided_slice %316 {offsets = [0, 40], sizes = [8, 8], strides = [1, 1]} : vector<8x68xf32> to vector<8x8xf32>
    %cst_95 = arith.constant dense<0.000000e+00> : vector<8x8xf32>
    %335 = tpu.matmul %333, %334, %cst_95 {dimension_numbers = #tpu.dot_dimension_numbers<[1], [1], [0], [0], [0, 0, 1, 0], [], []>} : vector<8x8xf32>, vector<8x8xf32>, vector<8x8xf32> -> vector<8x8xf32>
    %cst_96 = arith.constant dense<0xFF800000> : vector<8xf32>
    %336 = vector.multi_reduction <maximumf>, %335, %cst_96 [1] : vector<8x8xf32> to vector<8xf32>
    %337 = vector.shape_cast %336 : vector<8xf32> to vector<8x1xf32>
    %338 = vector.broadcast %337 : vector<8x1xf32> to vector<8x8xf32>
    %339 = arith.subf %335, %338 : vector<8x8xf32>
    %340 = math.exp %339 : vector<8x8xf32>
    %cst_97 = arith.constant dense<0.000000e+00> : vector<8xf32>
    %341 = vector.multi_reduction <add>, %340, %cst_97 [1] : vector<8x8xf32> to vector<8xf32>
    %342 = vector.shape_cast %341 : vector<8xf32> to vector<8x1xf32>
    %343 = vector.broadcast %342 : vector<8x1xf32> to vector<8x8xf32>
    %344 = arith.divf %340, %343 : vector<8x8xf32>
    %345 = vector.extract_strided_slice %316 {offsets = [0, 65], sizes = [8, 1], strides = [1, 1]} : vector<8x68xf32> to vector<8x1xf32>
    %cst_98 = arith.constant dense<0.000000e+00> : vector<8x1xf32>
    %346 = tpu.matmul %344, %345, %cst_98 {dimension_numbers = #tpu.dot_dimension_numbers<[1], [0], [0], [1], [0, 0, 1, 1], [], []>} : vector<8x8xf32>, vector<8x1xf32>, vector<8x1xf32> -> vector<8x1xf32>
    %347 = arith.addf %332, %346 : vector<8x1xf32>
    %348 = vector.extract_strided_slice %316 {offsets = [0, 16], sizes = [8, 8], strides = [1, 1]} : vector<8x68xf32> to vector<8x8xf32>
    %349 = vector.extract_strided_slice %316 {offsets = [0, 48], sizes = [8, 8], strides = [1, 1]} : vector<8x68xf32> to vector<8x8xf32>
    %cst_99 = arith.constant dense<0.000000e+00> : vector<8x8xf32>
    %350 = tpu.matmul %348, %349, %cst_99 {dimension_numbers = #tpu.dot_dimension_numbers<[1], [1], [0], [0], [0, 0, 1, 0], [], []>} : vector<8x8xf32>, vector<8x8xf32>, vector<8x8xf32> -> vector<8x8xf32>
    %cst_100 = arith.constant dense<0xFF800000> : vector<8xf32>
    %351 = vector.multi_reduction <maximumf>, %350, %cst_100 [1] : vector<8x8xf32> to vector<8xf32>
    %352 = vector.shape_cast %351 : vector<8xf32> to vector<8x1xf32>
    %353 = vector.broadcast %352 : vector<8x1xf32> to vector<8x8xf32>
    %354 = arith.subf %350, %353 : vector<8x8xf32>
    %355 = math.exp %354 : vector<8x8xf32>
    %cst_101 = arith.constant dense<0.000000e+00> : vector<8xf32>
    %356 = vector.multi_reduction <add>, %355, %cst_101 [1] : vector<8x8xf32> to vector<8xf32>
    %357 = vector.shape_cast %356 : vector<8xf32> to vector<8x1xf32>
    %358 = vector.broadcast %357 : vector<8x1xf32> to vector<8x8xf32>
    %359 = arith.divf %355, %358 : vector<8x8xf32>
    %360 = vector.extract_strided_slice %316 {offsets = [0, 66], sizes = [8, 1], strides = [1, 1]} : vector<8x68xf32> to vector<8x1xf32>
    %cst_102 = arith.constant dense<0.000000e+00> : vector<8x1xf32>
    %361 = tpu.matmul %359, %360, %cst_102 {dimension_numbers = #tpu.dot_dimension_numbers<[1], [0], [0], [1], [0, 0, 1, 1], [], []>} : vector<8x8xf32>, vector<8x1xf32>, vector<8x1xf32> -> vector<8x1xf32>
    %362 = arith.addf %347, %361 : vector<8x1xf32>
    %363 = vector.extract_strided_slice %316 {offsets = [0, 24], sizes = [8, 8], strides = [1, 1]} : vector<8x68xf32> to vector<8x8xf32>
    %364 = vector.extract_strided_slice %316 {offsets = [0, 56], sizes = [8, 8], strides = [1, 1]} : vector<8x68xf32> to vector<8x8xf32>
    %cst_103 = arith.constant dense<0.000000e+00> : vector<8x8xf32>
    %365 = tpu.matmul %363, %364, %cst_103 {dimension_numbers = #tpu.dot_dimension_numbers<[1], [1], [0], [0], [0, 0, 1, 0], [], []>} : vector<8x8xf32>, vector<8x8xf32>, vector<8x8xf32> -> vector<8x8xf32>
    %cst_104 = arith.constant dense<0xFF800000> : vector<8xf32>
    %366 = vector.multi_reduction <maximumf>, %365, %cst_104 [1] : vector<8x8xf32> to vector<8xf32>
    %367 = vector.shape_cast %366 : vector<8xf32> to vector<8x1xf32>
    %368 = vector.broadcast %367 : vector<8x1xf32> to vector<8x8xf32>
    %369 = arith.subf %365, %368 : vector<8x8xf32>
    %370 = math.exp %369 : vector<8x8xf32>
    %cst_105 = arith.constant dense<0.000000e+00> : vector<8xf32>
    %371 = vector.multi_reduction <add>, %370, %cst_105 [1] : vector<8x8xf32> to vector<8xf32>
    %372 = vector.shape_cast %371 : vector<8xf32> to vector<8x1xf32>
    %373 = vector.broadcast %372 : vector<8x1xf32> to vector<8x8xf32>
    %374 = arith.divf %370, %373 : vector<8x8xf32>
    %375 = vector.extract_strided_slice %316 {offsets = [0, 67], sizes = [8, 1], strides = [1, 1]} : vector<8x68xf32> to vector<8x1xf32>
    %cst_106 = arith.constant dense<0.000000e+00> : vector<8x1xf32>
    %376 = tpu.matmul %374, %375, %cst_106 {dimension_numbers = #tpu.dot_dimension_numbers<[1], [0], [0], [1], [0, 0, 1, 1], [], []>} : vector<8x8xf32>, vector<8x1xf32>, vector<8x1xf32> -> vector<8x1xf32>
    %377 = arith.addf %362, %376 : vector<8x1xf32>
    %378 = tpu.concatenate %67, %129, %191, %253, %315, %377 in 1 : vector<8x1xf32>, vector<8x1xf32>, vector<8x1xf32>, vector<8x1xf32>, vector<8x1xf32>, vector<8x1xf32> -> vector<8x6xf32>
    %c0_107 = arith.constant 0 : index
    %c0_108 = arith.constant 0 : index
    %379 = vector.load %arg4[%c0_107, %c0_108] : memref<8x128xf32, #tpu.memory_space<vmem>>, vector<8x128xf32>
    %cst_109 = arith.constant dense<0.000000e+00> : vector<6x128xf32>
    %380 = tpu.matmul %378, %379, %cst_109 {dimension_numbers = #tpu.dot_dimension_numbers<[0], [0], [1], [1], [0, 1, 1, 1], [], []>} : vector<8x6xf32>, vector<8x128xf32>, vector<6x128xf32> -> vector<6x128xf32>
    %c0_110 = arith.constant 0 : index
    %c0_111 = arith.constant 0 : index
    %381 = vector.load %arg5[%c0_110, %c0_111] : memref<1x128xf32, #tpu.memory_space<vmem>>, vector<1x128xf32>
    %382 = vector.broadcast %381 : vector<1x128xf32> to vector<6x128xf32>
    %383 = arith.addf %380, %382 : vector<6x128xf32>
    %c0_112 = arith.constant 0 : index
    %c0_113 = arith.constant 0 : index
    %384 = vector.load %arg6[%c0_112, %c0_113] : memref<6x128xf32, #tpu.memory_space<vmem>>, vector<6x128xf32>
    tpu.vector_store %arg6[%c0_112, %c0_113], %383 {strides = array<i32>} : memref<6x128xf32, #tpu.memory_space<vmem>>, vector<6x128xf32>,
    return
  }
  func.func @transform_0(%arg0: i32) -> (i32, i32) {
    %c0_i32 = arith.constant 0 : i32
    %c0_i32_0 = arith.constant 0 : i32
    %c0_i32_1 = arith.constant 0 : i32
    return %c0_i32, %c0_i32_0 : i32, i32
  }
  func.func @transform_1(%arg0: i32) -> (i32, i32) {
    %c0_i32 = arith.constant 0 : i32
    %c0_i32_0 = arith.constant 0 : i32
    %c0_i32_1 = arith.constant 0 : i32
    return %c0_i32, %c0_i32_0 : i32, i32
  }
  func.func @transform_2(%arg0: i32) -> (i32, i32) {
    %c0_i32 = arith.constant 0 : i32
    %c0_i32_0 = arith.constant 0 : i32
    %c0_i32_1 = arith.constant 0 : i32
    return %c0_i32, %c0_i32_0 : i32, i32
  }
  func.func @transform_3(%arg0: i32) -> (i32, i32) {
    %c0_i32 = arith.constant 0 : i32
    %c0_i32_0 = arith.constant 0 : i32
    %c0_i32_1 = arith.constant 0 : i32
    return %c0_i32, %c0_i32_0 : i32, i32
  }
  func.func @transform_4(%arg0: i32) -> (i32, i32) {
    %c0_i32 = arith.constant 0 : i32
    %c0_i32_0 = arith.constant 0 : i32
    %c0_i32_1 = arith.constant 0 : i32
    return %c0_i32, %c0_i32_0 : i32, i32
  }
  func.func @transform_5(%arg0: i32) -> (i32, i32) {
    %c0_i32 = arith.constant 0 : i32
    %c0_i32_0 = arith.constant 0 : i32
    %c0_i32_1 = arith.constant 0 : i32
    return %c0_i32, %c0_i32_0 : i32, i32
  }
}

</mosaic_0001>

<bundles_post_ra>
// kernel: tpu_custom_call.1
= control target key start
LH: loop header
LB: loop body
LE: loop exit
PB: predicated region body
PF: predicated region fallthrough
CT: control target
= control target key end

     0   :  { %vm36_vm0 = vcmask 130048   ;;  %s5615_s0 = inlined_call_operand.vmem [shape: f32[48,16], index: 0, kind: input, shape index: {}]   ;;  %s5616_s1 = inlined_call_operand.vmem [shape: f32[16,68], index: 1, kind: input, shape index: {}]   ;;  %s5617_s2 = inlined_call_operand.vmem [shape: f32[1,68], index: 2, kind: input, shape index: {}]   ;;  %s5618_s3 = inlined_call_operand.vmem [shape: f32[8,128], index: 3, kind: input, shape index: {}]   ;;  %s5619_s4 = inlined_call_operand.vmem [shape: f32[1,128], index: 4, kind: input, shape index: {}]   ;;  %s5620_s5 = inlined_call_operand.hbm [shape: f32[6,128], index: 5, kind: output, shape index: {}]  }
   0x1   :  { %v27_v0 = vld [vmem:[%s5616_s1] sm:$0xff]  ;;  %v28_v1 = vld [vmem:[%s5616_s1 + $0x8] sm:$0xff] }
   0x2   :  { %v21_v2 = vld [vmem:[%s5615_s0] sm:$0xff]  ;;  %v4720_v3 = vpack.c.bf16 %v28_v1, %v27_v0 }
   0x3   :  { %4466 = vmatprep.mubr.msk.f32.mxu0 %vm36_vm0, %v21_v2 }
   0x4   :  { %10 = vsyncpa [#allocation3], 0  ;;  %4721 = vmatprep.subr.bf16.mxu0 %v4720_v3  ;;  %v22_v4 = vld [vmem:[%s5615_s0 + $0x8] sm:$0xff]  ;;  %v23_v5 = vld [vmem:[%s5615_s0 + $0x10] sm:$0xff]  ;;  %v4899_v9 = vmov 0.0   ;;  %vm4900_vm1 = vmmov 0  }
   0x5   :  { %4723 = vmatpush3.bf16.msra.mxu0 %v4720_v3  ;;  %v24_v6 = vld [vmem:[%s5615_s0 + $0x18] sm:$0xff]  ;;  %v25_v7 = vld [vmem:[%s5615_s0 + $0x20] sm:$0xff]  ;;  %v26_v8 = vld [vmem:[%s5615_s0 + $0x28] sm:$0xff]  ;;  %4475 = vmatprep.subr.mxu1 %v4899_v9  ;;  %s4901_s0 = smov 120   ;;  %s4902_s10 = smov 96   ;;  %vm153_vm2 = vcmask 64512  }
   0x6   :  { %4495 = vmatprep.subr.mxu0 %v4899_v9  ;;  %4477 = vmatprep.mubr.msk.f32.mxu1 %vm4900_vm1, %v4899_v9  ;;  %v4275_v10 = vld [vmem:[%s5617_s2] ss:$0 sm:$0xff]  ;;  %s4903_s11 = smov 80   ;;  %s4904_s12 = smov 88   ;;  %vm4137_vm3 = vcmask 7168   ;;  %vm4139_vm4 = vcmask 15360  }
   0x7   :  { %s4905_s2 = smov 72   ;;  %s4906_s13 = smov 112   ;;  %vm4141_vm5 = vcmask 23552   ;;  %vm4143_vm6 = vcmask 31744   ;;  %vm4145_vm7 = vcmask 39936  }
   0x8   :  { %4467 = vmatmul.mubr.msk.f32.vlgmr.msra.gmra.mrb[0].mxu0 %vm36_vm0, %v22_v4  ;;  %s4907_s14 = smov 104   ;;  %s4908_s15 = smov 64  }
   0x9   :  { %4469 = vmatprep.mubr.msk.f32.mxu0 %vm36_vm0, %v23_v5  ;;  %s4909_s16 = smov 63   ;;  %s4910_s17 = smov 62  }
   0xa   :  { %s4911_s18 = smov 61   ;;  %s4912_s19 = smov 1  }
   0xb   :  { %s4913_s20 = smov 2   ;;  %s4914_s21 = smov 3  }
   0xc   :  { %4470 = vmatmul.mubr.msk.f32.gmra.mrb[2].mxu0 %vm36_vm0, %v24_v6  ;;  %s4915_s22 = smov 4   ;;  %s4916_s25 = smov 5  }
   0xd   :  { %4472 = vmatprep.mubr.msk.f32.mxu0 %vm36_vm0, %v25_v7  ;;  %s4917_s27 = smov [#allocation2]  }
   0xe   :  { %s4267_s1 = sshll.u32 %s4917_s27, 4  ;;  %s4268_s1 = int_to_ptr.vmem [resolvable:$true] %s4267_s1 }
   0xf   :  { %s4875_s28 = scalar_lea.vmem %s4268_s1, 128  ;;  %p4880_p1 = scmp.lt.s32.totalorder %s4268_s1, %s4268_s1 }
  0x10   :  { %4473 = vmatmul.mubr.msk.f32.gmra.mrb[4].mxu0 %vm36_vm0, %v26_v8  ;;  %p4876_p0 = scmp.ne.s32.totalorder %s4268_s1, %s4875_s28  ;;  %p4881_p2 = scmp.lt.s32.totalorder %s4875_s28, %s4875_s28 }
  0x11   :  { %4497 = vmatprep.mubr.msk.f32.mxu0 %vm4900_vm1, %v4899_v9 }
  0x12   :  { %p4882_p3 = por %p4881_p2, %p4880_p1 }
  0x14   :  { %p4883_p4 = pnand %p4882_p3, %p4876_p0 }
  0xdb   :  { %v4468_v11 = vpop.f32.mrb[0].mxu0 }
  0xdc   :  { %v121_v12 = vpop.f32.mrb[1].mxu0  ;;  %v4997_v19 = vadd.f32 %v4468_v11, %v4275_v10 }
  0xdd   :  { %v4981_v13 = vadd.f32 %v4275_v10, %v121_v12 }
  0xdf   :  { %239 = vrot.lane.b32.xlu1 %v4981_v13, %s4901_s0  ;;  %151 = vrot.lane.b32.xlu0 %v4981_v13, %s4902_s10  ;;  %v4471_v14 = vpop.f32.mrb[2].mxu0 }
  0xe0   :  { %v131_v15 = vpop.f32.mrb[3].mxu0  ;;  %v5025_v21 = vadd.f32 %v4471_v14, %v4275_v10 }
  0xe1   :  { %v5015_v20 = vadd.f32 %v4275_v10, %v131_v15 }
  0xe3   :  { %482 = vrot.lane.b32.xlu1 %v4981_v13, %s4903_s11  ;;  %241 = vrot.lane.b32.xlu0 %v4981_v13, %s4904_s12  ;;  %v4474_v16 = vpop.f32.mrb[4].mxu0 }
  0xe4   :  { %v4991_v17 = vadd.f32 %v4474_v16, %v4275_v10  ;;  %v141_v18 = vpop.f32.mrb[5].mxu0 }
  0xe5   :  { %v5047_v22 = vadd.f32 %v4275_v10, %v141_v18 }
  0xe7   :  { %648 = vrot.lane.b32.xlu1 %v4981_v13, %s4905_s2  ;;  %480 = vrot.lane.b32.xlu0 %v4981_v13, %s4906_s13 }
  0xeb   :  { %813 = vrot.lane.b32.xlu1 %v4997_v19, %s4902_s10  ;;  %646 = vrot.lane.b32.xlu0 %v4981_v13, %s4907_s14 }
  0xef   :  { %900 = vrot.lane.b32.xlu1 %v4997_v19, %s4901_s0  ;;  %902 = vrot.lane.b32.xlu0 %v4997_v19, %s4904_s12 }
  0xf3   :  { %1141 = vrot.lane.b32.xlu1 %v4997_v19, %s4906_s13  ;;  %1143 = vrot.lane.b32.xlu0 %v4997_v19, %s4903_s11 }
  0xf7   :  { %1307 = vrot.lane.b32.xlu1 %v4997_v19, %s4907_s14  ;;  %1309 = vrot.lane.b32.xlu0 %v4997_v19, %s4905_s2 }
  0xfb   :  { %1563 = vrot.lane.b32.xlu1 %v5015_v20, %s4904_s12  ;;  %1474 = vrot.lane.b32.xlu0 %v5015_v20, %s4902_s10 }
  0xff   :  { %1804 = vrot.lane.b32.xlu1 %v5015_v20, %s4903_s11  ;;  %1561 = vrot.lane.b32.xlu0 %v5015_v20, %s4901_s0 }
 0x103   :  { %1970 = vrot.lane.b32.xlu1 %v5015_v20, %s4905_s2  ;;  %1802 = vrot.lane.b32.xlu0 %v5015_v20, %s4906_s13 }
 0x107   :  { %2135 = vrot.lane.b32.xlu1 %v5025_v21, %s4902_s10  ;;  %1968 = vrot.lane.b32.xlu0 %v5015_v20, %s4907_s14 }
 0x10b   :  { %2222 = vrot.lane.b32.xlu1 %v5025_v21, %s4901_s0  ;;  %2224 = vrot.lane.b32.xlu0 %v5025_v21, %s4904_s12 }
 0x10f   :  { %2463 = vrot.lane.b32.xlu1 %v5025_v21, %s4906_s13  ;;  %2465 = vrot.lane.b32.xlu0 %v5025_v21, %s4903_s11 }
 0x113   :  { %2629 = vrot.lane.b32.xlu1 %v5025_v21, %s4907_s14  ;;  %2631 = vrot.lane.b32.xlu0 %v5025_v21, %s4905_s2 }
 0x117   :  { %2885 = vrot.lane.b32.xlu1 %v5047_v22, %s4904_s12  ;;  %2796 = vrot.lane.b32.xlu0 %v5047_v22, %s4902_s10 }
 0x11b   :  { %3126 = vrot.lane.b32.xlu1 %v5047_v22, %s4903_s11  ;;  %2883 = vrot.lane.b32.xlu0 %v5047_v22, %s4901_s0 }
 0x11f   :  { %3292 = vrot.lane.b32.xlu1 %v5047_v22, %s4905_s2  ;;  %3124 = vrot.lane.b32.xlu0 %v5047_v22, %s4906_s13 }
 0x123   :  { %3457 = vrot.lane.b32.xlu1 %v4991_v17, %s4902_s10  ;;  %3290 = vrot.lane.b32.xlu0 %v5047_v22, %s4907_s14 }
 0x127   :  { %3544 = vrot.lane.b32.xlu1 %v4991_v17, %s4901_s0  ;;  %3546 = vrot.lane.b32.xlu0 %v4991_v17, %s4904_s12 }
 0x12b   :  { %3785 = vrot.lane.b32.xlu1 %v4991_v17, %s4906_s13  ;;  %3787 = vrot.lane.b32.xlu0 %v4991_v17, %s4903_s11 }
 0x12f   :  { %3951 = vrot.lane.b32.xlu1 %v4991_v17, %s4907_s14  ;;  %3953 = vrot.lane.b32.xlu0 %v4991_v17, %s4905_s2 }
 0x133   :  { %404 = vrot.lane.b32.xlu1 %v4981_v13, %s4908_s15  ;;  %328 = vrot.lane.b32.xlu0 %v4981_v13, %s4909_s16 }
 0x137   :  { %569 = vrot.lane.b32.xlu0 %v4981_v13, %s4910_s17 }
 0x151   :  { %v240_v23 = vpop.permute.xlu1 %239  ;;  %v152_v24 = vpop.permute.xlu0 %151 }
 0x152   :  { %4476 = vmatpush3.xpose.msk.msra.mxu1 %vm153_vm2, %v152_v24 }
 0x153   :  { %4480 = vmatprep.subr.mxu1 %v4899_v9 }
 0x155   :  { %v483_v25 = vpop.permute.xlu1 %482  ;;  %4478 = vmatmul.mubr.msk.f32.vlgmr.msra.gmra.mrb[0].mxu1 %vm153_vm2, %v4981_v13  ;;  %v242_v26 = vpop.permute.xlu0 %241 }
 0x156   :  { %4481 = vmatpush3.xpose.msk.msra.mxu1 %vm153_vm2, %v242_v26  ;;  %4496 = vmatpush3.xpose.msk.msra.mxu0 %vm153_vm2, %v483_v25 }
 0x157   :  { %4482 = vmatprep.mubr.msk.f32.mxu1 %vm4900_vm1, %v4899_v9  ;;  %4505 = vmatprep.subr.mxu0 %v4899_v9 }
 0x158   :  { %4485 = vmatprep.subr.mxu1 %v4899_v9 }
 0x159   :  { %v649_v27 = vpop.permute.xlu1 %648  ;;  %4483 = vmatmul.mubr.msk.f32.vlgmr.msra.gmra.mrb[2].mxu1 %vm153_vm2, %v240_v23  ;;  %v481_v28 = vpop.permute.xlu0 %480 }
 0x15a   :  { %4498 = vmatmul.mubr.msk.f32.vlgmr.msra.gmra.mrb[6].mxu0 %vm153_vm2, %v481_v28  ;;  %4487 = vmatprep.mubr.msk.f32.mxu1 %vm4900_vm1, %v4899_v9 }
 0x15b   :  { %4506 = vmatpush3.xpose.msk.msra.mxu0 %vm153_vm2, %v649_v27  ;;  %4507 = vmatprep.mubr.msk.f32.mxu0 %vm4900_vm1, %v4899_v9 }
 0x15c   :  { %4515 = vmatprep.subr.mxu0 %v4899_v9 }
 0x15d   :  { %v814_v29 = vpop.permute.xlu1 %813  ;;  %v647_v30 = vpop.permute.xlu0 %646 }
 0x15e   :  { %4508 = vmatmul.mubr.msk.f32.vlgmr.msra.gmra.mrb[8].mxu0 %vm153_vm2, %v647_v30 }
 0x15f   :  { %4516 = vmatpush3.xpose.msk.msra.mxu0 %vm153_vm2, %v814_v29  ;;  %4517 = vmatprep.mubr.msk.f32.mxu0 %vm4900_vm1, %v4899_v9 }
 0x160   :  { %4520 = vmatprep.subr.mxu0 %v4899_v9 }
 0x161   :  { %v901_v31 = vpop.permute.xlu1 %900  ;;  %v903_v32 = vpop.permute.xlu0 %902 }
 0x162   :  { %4518 = vmatmul.mubr.msk.f32.vlgmr.msra.gmra.mrb[10].mxu0 %vm153_vm2, %v4997_v19 }
 0x163   :  { %4521 = vmatpush3.xpose.msk.msra.mxu0 %vm153_vm2, %v903_v32  ;;  %4522 = vmatprep.mubr.msk.f32.mxu0 %vm4900_vm1, %v4899_v9 }
 0x164   :  { %4535 = vmatprep.subr.mxu0 %v4899_v9 }
 0x165   :  { %v1142_v33 = vpop.permute.xlu1 %1141  ;;  %v1144_v34 = vpop.permute.xlu0 %1143 }
 0x166   :  { %4523 = vmatmul.mubr.msk.f32.vlgmr.msra.gmra.mrb[12].mxu0 %vm153_vm2, %v901_v31 }
 0x167   :  { %4536 = vmatpush3.xpose.msk.msra.mxu0 %vm153_vm2, %v1144_v34  ;;  %4537 = vmatprep.mubr.msk.f32.mxu0 %vm4900_vm1, %v4899_v9 }
 0x168   :  { %4545 = vmatprep.subr.mxu0 %v4899_v9 }
 0x169   :  { %v1308_v35 = vpop.permute.xlu1 %1307  ;;  %v1310_v36 = vpop.permute.xlu0 %1309 }
 0x16a   :  { %4538 = vmatmul.mubr.msk.f32.vlgmr.msra.gmra.mrb[14].mxu0 %vm153_vm2, %v1142_v33 }
 0x16b   :  { %4546 = vmatpush3.xpose.msk.msra.mxu0 %vm153_vm2, %v1310_v36  ;;  %4547 = vmatprep.mubr.msk.f32.mxu0 %vm4900_vm1, %v4899_v9 }
 0x16c   :  { %4555 = vmatprep.subr.mxu0 %v4899_v9 }
 0x16d   :  { %v1564_v37 = vpop.permute.xlu1 %1563  ;;  %v1475_v38 = vpop.permute.xlu0 %1474 }
 0x16e   :  { %4548 = vmatmul.mubr.msk.f32.vlgmr.msra.gmra.mrb[16].mxu0 %vm153_vm2, %v1308_v35 }
 0x16f   :  { %4556 = vmatpush3.xpose.msk.msra.mxu0 %vm153_vm2, %v1475_v38  ;;  %4557 = vmatprep.mubr.msk.f32.mxu0 %vm4900_vm1, %v4899_v9 }
 0x170   :  { %4560 = vmatprep.subr.mxu0 %v4899_v9 }
 0x171   :  { %v1805_v39 = vpop.permute.xlu1 %1804  ;;  %v1562_v40 = vpop.permute.xlu0 %1561 }
 0x172   :  { %4558 = vmatmul.mubr.msk.f32.vlgmr.msra.gmra.mrb[18].mxu0 %vm153_vm2, %v5015_v20 }
 0x173   :  { %4561 = vmatpush3.xpose.msk.msra.mxu0 %vm153_vm2, %v1564_v37  ;;  %4562 = vmatprep.mubr.msk.f32.mxu0 %vm4900_vm1, %v4899_v9 }
 0x174   :  { %4575 = vmatprep.subr.mxu0 %v4899_v9 }
 0x175   :  { %v1971_v41 = vpop.permute.xlu1 %1970  ;;  %v1803_v42 = vpop.permute.xlu0 %1802 }
 0x176   :  { %4563 = vmatmul.mubr.msk.f32.vlgmr.msra.gmra.mrb[20].mxu0 %vm153_vm2, %v1562_v40 }
 0x177   :  { %4576 = vmatpush3.xpose.msk.msra.mxu0 %vm153_vm2, %v1805_v39  ;;  %4577 = vmatprep.mubr.msk.f32.mxu0 %vm4900_vm1, %v4899_v9 }
 0x178   :  { %4585 = vmatprep.subr.mxu0 %v4899_v9 }
 0x179   :  { %v2136_v43 = vpop.permute.xlu1 %2135  ;;  %v1969_v44 = vpop.permute.xlu0 %1968 }
 0x17a   :  { %4578 = vmatmul.mubr.msk.f32.vlgmr.msra.gmra.mrb[22].mxu0 %vm153_vm2, %v1803_v42 }
 0x17b   :  { %4586 = vmatpush3.xpose.msk.msra.mxu0 %vm153_vm2, %v1971_v41  ;;  %4587 = vmatprep.mubr.msk.f32.mxu0 %vm4900_vm1, %v4899_v9 }
 0x17c   :  { %4595 = vmatprep.subr.mxu0 %v4899_v9 }
 0x17d   :  { %v2223_v45 = vpop.permute.xlu1 %2222  ;;  %v2225_v46 = vpop.permute.xlu0 %2224 }
 0x17e   :  { %4588 = vmatmul.mubr.msk.f32.vlgmr.msra.gmra.mrb[24].mxu0 %vm153_vm2, %v1969_v44 }
 0x17f   :  { %4596 = vmatpush3.xpose.msk.msra.mxu0 %vm153_vm2, %v2136_v43  ;;  %4597 = vmatprep.mubr.msk.f32.mxu0 %vm4900_vm1, %v4899_v9 }
 0x180   :  { %4600 = vmatprep.subr.mxu0 %v4899_v9 }
 0x181   :  { %v2464_v47 = vpop.permute.xlu1 %2463  ;;  %v2466_v48 = vpop.permute.xlu0 %2465 }
 0x182   :  { %4598 = vmatmul.mubr.msk.f32.vlgmr.msra.gmra.mrb[26].mxu0 %vm153_vm2, %v5025_v21 }
 0x183   :  { %4601 = vmatpush3.xpose.msk.msra.mxu0 %vm153_vm2, %v2225_v46  ;;  %4602 = vmatprep.mubr.msk.f32.mxu0 %vm4900_vm1, %v4899_v9 }
 0x184   :  { %4615 = vmatprep.subr.mxu0 %v4899_v9 }
 0x185   :  { %v2630_v49 = vpop.permute.xlu1 %2629  ;;  %v2632_v50 = vpop.permute.xlu0 %2631 }
 0x186   :  { %4603 = vmatmul.mubr.msk.f32.vlgmr.msra.gmra.mrb[28].mxu0 %vm153_vm2, %v2223_v45 }
 0x187   :  { %4616 = vmatpush3.xpose.msk.msra.mxu0 %vm153_vm2, %v2466_v48  ;;  %4617 = vmatprep.mubr.msk.f32.mxu0 %vm4900_vm1, %v4899_v9 }
 0x188   :  { %4625 = vmatprep.subr.mxu0 %v4899_v9 }
 0x189   :  { %v2886_v51 = vpop.permute.xlu1 %2885  ;;  %v2797_v52 = vpop.permute.xlu0 %2796 }
 0x18a   :  { %4618 = vmatmul.mubr.msk.f32.vlgmr.msra.gmra.mrb[30].mxu0 %vm153_vm2, %v2464_v47 }
 0x18b   :  { %4626 = vmatpush3.xpose.msk.msra.mxu0 %vm153_vm2, %v2632_v50  ;;  %4627 = vmatprep.mubr.msk.f32.mxu0 %vm4900_vm1, %v4899_v9 }
 0x18c   :  { %4635 = vmatprep.subr.mxu0 %v4899_v9 }
 0x18d   :  { %v2884_v53 = vpop.permute.xlu0 %2883  ;;  %v3127_v54 = vpop.permute.xlu1 %3126 }
 0x18e   :  { %4628 = vmatmul.mubr.msk.f32.vlgmr.msra.gmra.mrb[32].mxu0 %vm153_vm2, %v2630_v49 }
 0x18f   :  { %4636 = vmatpush3.xpose.msk.msra.mxu0 %vm153_vm2, %v2797_v52  ;;  %4637 = vmatprep.mubr.msk.f32.mxu0 %vm4900_vm1, %v4899_v9 }
 0x190   :  { %4640 = vmatprep.subr.mxu0 %v4899_v9 }
 0x191   :  { %v3125_v55 = vpop.permute.xlu0 %3124  ;;  %v3293_v56 = vpop.permute.xlu1 %3292 }
 0x192   :  { %4638 = vmatmul.mubr.msk.f32.vlgmr.msra.gmra.mrb[34].mxu0 %vm153_vm2, %v5047_v22 }
 0x193   :  { %4641 = vmatpush3.xpose.msk.msra.mxu0 %vm153_vm2, %v2886_v51  ;;  %4642 = vmatprep.mubr.msk.f32.mxu0 %vm4900_vm1, %v4899_v9 }
 0x194   :  { %4655 = vmatprep.subr.mxu0 %v4899_v9 }
 0x195   :  { %v3291_v57 = vpop.permute.xlu0 %3290  ;;  %v3458_v59 = vpop.permute.xlu1 %3457 }
 0x196   :  { %4643 = vmatmul.mubr.msk.f32.vlgmr.msra.gmra.mrb[36].mxu0 %vm153_vm2, %v2884_v53 }
 0x197   :  { %4656 = vmatpush3.xpose.msk.msra.mxu0 %vm153_vm2, %v3127_v54  ;;  %4657 = vmatprep.mubr.msk.f32.mxu0 %vm4900_vm1, %v4899_v9 }
 0x198   :  { %4665 = vmatprep.subr.mxu0 %v4899_v9 }
 0x199   :  { %v3547_v58 = vpop.permute.xlu0 %3546  ;;  %v3545_v61 = vpop.permute.xlu1 %3544 }
 0x19a   :  { %4658 = vmatmul.mubr.msk.f32.vlgmr.msra.gmra.mrb[38].mxu0 %vm153_vm2, %v3125_v55 }
 0x19b   :  { %4666 = vmatpush3.xpose.msk.msra.mxu0 %vm153_vm2, %v3293_v56  ;;  %4667 = vmatprep.mubr.msk.f32.mxu0 %vm4900_vm1, %v4899_v9 }
 0x19c   :  { %4675 = vmatprep.subr.mxu0 %v4899_v9 }
 0x19d   :  { %v3788_v60 = vpop.permute.xlu0 %3787  ;;  %v3786_v0 = vpop.permute.xlu1 %3785 }
 0x19e   :  { %4668 = vmatmul.mubr.msk.f32.vlgmr.msra.gmra.mrb[40].mxu0 %vm153_vm2, %v3291_v57 }
 0x19f   :  { %4676 = vmatpush3.xpose.msk.msra.mxu0 %vm153_vm2, %v3458_v59  ;;  %4677 = vmatprep.mubr.msk.f32.mxu0 %vm4900_vm1, %v4899_v9 }
 0x1a0   :  { %4680 = vmatprep.subr.mxu0 %v4899_v9 }
 0x1a1   :  { %v3954_v62 = vpop.permute.xlu0 %3953  ;;  %v3952_v1 = vpop.permute.xlu1 %3951 }
 0x1a2   :  { %4678 = vmatmul.mubr.msk.f32.vlgmr.msra.gmra.mrb[42].mxu0 %vm153_vm2, %v4991_v17 }
 0x1a3   :  { %4681 = vmatpush3.xpose.msk.msra.mxu0 %vm153_vm2, %v3547_v58  ;;  %4682 = vmatprep.mubr.msk.f32.mxu0 %vm4900_vm1, %v4899_v9 }
 0x1a4   :  { %4695 = vmatprep.subr.mxu0 %v4899_v9 }
 0x1a5   :  { %v329_v63 = vpop.permute.xlu0 %328 }
 0x1a6   :  { %4486 = vmatpush3.msra.mxu1 %v329_v63  ;;  %4683 = vmatmul.mubr.msk.f32.vlgmr.msra.gmra.mrb[44].mxu0 %vm153_vm2, %v3545_v61 }
 0x1a7   :  { %4696 = vmatpush3.xpose.msk.msra.mxu0 %vm153_vm2, %v3788_v60  ;;  %4697 = vmatprep.mubr.msk.f32.mxu0 %vm4900_vm1, %v4899_v9 }
 0x1a8   :  { %4705 = vmatprep.subr.mxu0 %v4899_v9  ;;  %4490 = vmatprep.subr.mxu1 %v4899_v9 }
 0x1aa   :  { %4698 = vmatmul.mubr.msk.f32.vlgmr.msra.gmra.mrb[46].mxu0 %vm153_vm2, %v3786_v0 }
 0x1ab   :  { %4706 = vmatpush3.xpose.msk.msra.mxu0 %vm153_vm2, %v3954_v62  ;;  %4707 = vmatprep.mubr.msk.f32.mxu0 %vm4900_vm1, %v4899_v9 }
 0x1ac   :  { %4715 = vmatprep.subr.mxu0 %v4899_v9 }
 0x1ae   :  { %4708 = vmatmul.mubr.msk.f32.vlgmr.msra.gmra.mrb[48].mxu0 %vm153_vm2, %v3952_v1 }
 0x1af   :  { %4717 = vmatprep.mubr.msk.f32.mxu0 %vm4900_vm1, %v4899_v9 }
 0x228   :  { %v5210_v2 = vpop.f32.mrb[0].mxu1 }
 0x229   :  { %v4479_v3 = vpop.f32.mrb[1].mxu1  ;;  %v228_v4 = vsel %vm153_vm2, %v5210_v2, -inf }
 0x22a   :  { %229 = vmax.xlane.f32.xlu1 %v228_v4 }
 0x22c   :  { %v5214_v5 = vpop.f32.mrb[2].mxu1 }
 0x22d   :  { %v4484_v6 = vpop.f32.mrb[3].mxu1  ;;  %v5216_v7 = vpop.f32.mrb[6].mxu0  ;;  %v317_v14 = vsel %vm153_vm2, %v5214_v5, -inf }
 0x22e   :  { %v4499_v8 = vpop.f32.mrb[7].mxu0  ;;  %v558_v10 = vsel %vm153_vm2, %v5216_v7, -inf }
 0x22f   :  { %559 = vmax.xlane.f32.xlu0 %v558_v10 }
 0x231   :  { %v5220_v11 = vpop.f32.mrb[8].mxu0 }
 0x232   :  { %v4509_v12 = vpop.f32.mrb[9].mxu0  ;;  %v724_v18 = vsel %vm153_vm2, %v5220_v11, -inf }
 0x233   :  { %318 = vmax.xlane.f32.xlu0 %v317_v14 }
 0x235   :  { %v5224_v15 = vpop.f32.mrb[10].mxu0 }
 0x236   :  { %v4519_v16 = vpop.f32.mrb[11].mxu0  ;;  %v889_v25 = vsel %vm153_vm2, %v5224_v15, -inf }
 0x237   :  { %725 = vmax.xlane.f32.xlu0 %v724_v18 }
 0x239   :  { %v5228_v23 = vpop.f32.mrb[12].mxu0 }
 0x23a   :  { %v4524_v24 = vpop.f32.mrb[13].mxu0  ;;  %v978_v26 = vsel %vm153_vm2, %v5228_v23, -inf }
 0x23b   :  { %890 = vmax.xlane.f32.xlu0 %v889_v25  ;;  %979 = vmax.xlane.f32.xlu1 %v978_v26 }
 0x23d   :  { %v5234_v27 = vpop.f32.mrb[14].mxu0 }
 0x23e   :  { %v4539_v28 = vpop.f32.mrb[15].mxu0  ;;  %v1219_v52 = vsel %vm153_vm2, %v5234_v27, -inf }
 0x23f   :  { %v5306_v28 = vpop.permute.xlu1 %404 }
 0x241   :  { %v5236_v29 = vpop.f32.mrb[16].mxu0 }
 0x242   :  { %v4549_v30 = vpop.f32.mrb[17].mxu0  ;;  %v1385_v53 = vsel %vm153_vm2, %v5236_v29, -inf }
 0x245   :  { %v5238_v31 = vpop.f32.mrb[18].mxu0 }
 0x246   :  { %v4559_v32 = vpop.f32.mrb[19].mxu0  ;;  %v1550_v57 = vsel %vm153_vm2, %v5238_v31, -inf }
 0x247   :  { %v5308_v32 = vpop.permute.xlu0 %569 }
 0x249   :  { %v5240_v33 = vpop.f32.mrb[20].mxu0 }
 0x24a   :  { %v4564_v34 = vpop.f32.mrb[21].mxu0  ;;  %v1639_v55 = vsel %vm153_vm2, %v5240_v33, -inf }
 0x24c   :  { %735 = vrot.lane.b32.xlu1 %v4981_v13, %s4911_s18 }
 0x24d   :  { %v5244_v35 = vpop.f32.mrb[22].mxu0 }
 0x24e   :  { %v4579_v36 = vpop.f32.mrb[23].mxu0  ;;  %v1880_v59 = vsel %vm153_vm2, %v5244_v35, -inf }
 0x251   :  { %989 = vrot.lane.b32.xlu0 %v4997_v19, %s4909_s16  ;;  %v5248_v37 = vpop.f32.mrb[24].mxu0 }
 0x252   :  { %v4589_v38 = vpop.f32.mrb[25].mxu0  ;;  %v2046_v60 = vsel %vm153_vm2, %v5248_v37, -inf }
 0x255   :  { %v5250_v39 = vpop.f32.mrb[26].mxu0 }
 0x256   :  { %v4599_v40 = vpop.f32.mrb[27].mxu0  ;;  %v2211_v0 = vsel %vm153_vm2, %v5250_v39, -inf }
 0x259   :  { %v5252_v41 = vpop.f32.mrb[28].mxu0 }
 0x25a   :  { %v4604_v42 = vpop.f32.mrb[29].mxu0  ;;  %v2300_v1 = vsel %vm153_vm2, %v5252_v41, -inf }
 0x25d   :  { %v5254_v43 = vpop.f32.mrb[30].mxu0 }
 0x25e   :  { %v4619_v44 = vpop.f32.mrb[31].mxu0  ;;  %v2541_v6 = vsel %vm153_vm2, %v5254_v43, -inf }
 0x261   :  { %v5256_v45 = vpop.f32.mrb[32].mxu0 }
 0x262   :  { %v4629_v13 = vpop.f32.mrb[33].mxu0  ;;  %v2707_v12 = vsel %vm153_vm2, %v5256_v45, -inf }
 0x265   :  { %v5258_v46 = vpop.f32.mrb[34].mxu0 }
 0x266   :  { %v4639_v47 = vpop.f32.mrb[35].mxu0  ;;  %v2872_v14 = vsel %vm153_vm2, %v5258_v46, -inf }
 0x269   :  { %v5260_v48 = vpop.f32.mrb[36].mxu0 }
 0x26a   :  { %v4644_v49 = vpop.f32.mrb[37].mxu0  ;;  %v2961_v16 = vsel %vm153_vm2, %v5260_v48, -inf }
 0x26d   :  { %v5262_v50 = vpop.f32.mrb[38].mxu0 }
 0x26e   :  { %v4659_v51 = vpop.f32.mrb[39].mxu0  ;;  %v3202_v18 = vsel %vm153_vm2, %v5262_v50, -inf }
 0x270   :  { %1220 = vmax.xlane.f32.xlu1 %v1219_v52  ;;  %1386 = vmax.xlane.f32.xlu0 %v1385_v53 }
 0x271   :  { %v5268_v54 = vpop.f32.mrb[40].mxu0 }
 0x272   :  { %v4669_v56 = vpop.f32.mrb[41].mxu0  ;;  %v3368_v24 = vsel %vm153_vm2, %v5268_v54, -inf }
 0x274   :  { %1551 = vmax.xlane.f32.xlu0 %v1550_v57  ;;  %1640 = vmax.xlane.f32.xlu1 %v1639_v55 }
 0x275   :  { %v5274_v58 = vpop.f32.mrb[42].mxu0 }
 0x276   :  { %v4679_v61 = vpop.f32.mrb[43].mxu0  ;;  %v3533_v25 = vsel %vm153_vm2, %v5274_v58, -inf }
 0x278   :  { %1881 = vmax.xlane.f32.xlu1 %v1880_v59  ;;  %2047 = vmax.xlane.f32.xlu0 %v2046_v60 }
 0x279   :  { %v5280_v62 = vpop.f32.mrb[44].mxu0 }
 0x27a   :  { %v4684_v63 = vpop.f32.mrb[45].mxu0  ;;  %v3622_v26 = vsel %vm153_vm2, %v5280_v62, -inf }
 0x27c   :  { %2212 = vmax.xlane.f32.xlu1 %v2211_v0 }
 0x27d   :  { %v5286_v3 = vpop.f32.mrb[46].mxu0 }
 0x27e   :  { %v4699_v4 = vpop.f32.mrb[47].mxu0 }
 0x280   :  { %2301 = vmax.xlane.f32.xlu1 %v2300_v1 }
 0x281   :  { %v5290_v8 = vpop.f32.mrb[48].mxu0 }
 0x282   :  { %v4709_v10 = vpop.f32.mrb[49].mxu0 }
 0x284   :  { %2542 = vmax.xlane.f32.xlu1 %v2541_v6 }
 0x288   :  { %2708 = vmax.xlane.f32.xlu1 %v2707_v12 }
 0x28c   :  { %2873 = vmax.xlane.f32.xlu1 %v2872_v14 }
 0x290   :  { %2962 = vmax.xlane.f32.xlu1 %v2961_v16 }
 0x294   :  { %3203 = vmax.xlane.f32.xlu1 %v3202_v18 }
 0x298   :  { %3369 = vmax.xlane.f32.xlu1 %v3368_v24 }
 0x29c   :  { %3534 = vmax.xlane.f32.xlu1 %v3533_v25 }
 0x2a0   :  { %3623 = vmax.xlane.f32.xlu1 %v3622_v26 }
 0x2b7   :  { %v230_v30 = vpop.xlane.xlu1 %229 }
 0x2b8   :  { %v231_v34 = vsub.f32 %v5210_v2, %v230_v30 }
 0x2ba   :  { %v232_v36 = vmul.f32 1.442695, %v231_v34 }
 0x2bc   :  { %4779 = vpow2.f32 %v232_v36  ;;  %v560_v38 = vpop.xlane.xlu0 %559 }
 0x2bd   :  { %v561_v40 = vsub.f32 %v5216_v7, %v560_v38 }
 0x2bf   :  { %v562_v42 = vmul.f32 1.442695, %v561_v40 }
 0x2c0   :  { %v319_v44 = vpop.xlane.xlu0 %318 }
 0x2c1   :  { %4781 = vpow2.f32 %v562_v42  ;;  %v320_v13 = vsub.f32 %v5214_v5, %v319_v44 }
 0x2c3   :  { %v321_v47 = vmul.f32 1.442695, %v320_v13 }
 0x2c4   :  { %v726_v49 = vpop.xlane.xlu0 %725 }
 0x2c5   :  { %4783 = vpow2.f32 %v321_v47  ;;  %v727_v51 = vsub.f32 %v5220_v11, %v726_v49 }
 0x2c6   :  { %v5314_v52 = vpop.eup %4779 }
 0x2c7   :  { %v728_v53 = vmul.f32 1.442695, %v727_v51  ;;  %v234_v2 = vsel %vm153_vm2, %v5314_v52, 0.0  ;;  %v4029_v51 = vsel %vm153_vm2, %v5290_v8, -inf }
 0x2c8   :  { %v980_v55 = vpop.xlane.xlu1 %979  ;;  %235 = vadd.xlane.f32.xlu0 %v234_v2  ;;  %v891_v0 = vpop.xlane.xlu0 %890 }
 0x2c9   :  { %4785 = vpow2.f32 %v728_v53  ;;  %v981_v7 = vsub.f32 %v5228_v23, %v980_v55  ;;  %v892_v1 = vsub.f32 %v5224_v15, %v891_v0 }
 0x2cb   :  { %v5319_v56 = vpop.eup %4781  ;;  %v982_v57 = vmul.f32 1.442695, %v981_v7  ;;  %v893_v4 = vmul.f32 1.442695, %v892_v1 }
 0x2cc   :  { %v564_v5 = vsel %vm153_vm2, %v5319_v56, 0.0  ;;  %v5338_v6 = vpop.permute.xlu1 %735  ;;  %v5340_v10 = vpop.permute.xlu0 %989 }
 0x2cd   :  { %4787 = vpow2.f32 %v982_v57  ;;  %565 = vadd.xlane.f32.xlu0 %v564_v5 }
 0x2ce   :  { %4789 = vpow2.f32 %v893_v4 }
 0x2cf   :  { %v5323_v11 = vpop.eup %4783 }
 0x2d0   :  { %v323_v59 = vsel %vm153_vm2, %v5323_v11, 0.0 }
 0x2d1   :  { %324 = vadd.xlane.f32.xlu0 %v323_v59 }
 0x2d3   :  { %v5327_v60 = vpop.eup %4785 }
 0x2d4   :  { %v730_v61 = vsel %vm153_vm2, %v5327_v60, 0.0 }
 0x2d5   :  { %731 = vadd.xlane.f32.xlu0 %v730_v61 }
 0x2d7   :  { %v5331_v23 = vpop.eup %4787 }
 0x2d8   :  { %v984_v63 = vsel %vm153_vm2, %v5331_v23, 0.0  ;;  %v5346_v40 = vpop.eup %4789 }
 0x2d9   :  { %985 = vadd.xlane.f32.xlu1 %v984_v63 }
 0x2eb   :  { %1065 = vrot.lane.b32.xlu0 %v4997_v19, %s4908_s15 }
 0x2fd   :  { %v1221_v12 = vpop.xlane.xlu1 %1220  ;;  %v1387_v14 = vpop.xlane.xlu0 %1386 }
 0x2fe   :  { %v1222_v16 = vsub.f32 %v5234_v27, %v1221_v12  ;;  %v1388_v18 = vsub.f32 %v5236_v29, %v1387_v14  ;;  %v895_v27 = vsel %vm153_vm2, %v5346_v40, 0.0 }
 0x300   :  { %v1223_v24 = vmul.f32 1.442695, %v1222_v16  ;;  %v1389_v25 = vmul.f32 1.442695, %v1388_v18 }
 0x301   :  { %v1641_v26 = vpop.xlane.xlu1 %1640  ;;  %v1552_v30 = vpop.xlane.xlu0 %1551 }
 0x302   :  { %4791 = vpow2.f32 %v1223_v24  ;;  %v1642_v34 = vsub.f32 %v5240_v33, %v1641_v26  ;;  %v1553_v15 = vsub.f32 %v5238_v31, %v1552_v30  ;;  %v3863_v33 = vsel %vm153_vm2, %v5286_v3, -inf }
 0x303   :  { %4793 = vpow2.f32 %v1389_v25 }
 0x304   :  { %v1554_v36 = vmul.f32 1.442695, %v1553_v15  ;;  %v1643_v38 = vmul.f32 1.442695, %v1642_v34 }
 0x305   :  { %v1882_v2 = vpop.xlane.xlu1 %1881  ;;  %v2048_v59 = vpop.xlane.xlu0 %2047 }
 0x306   :  { %4795 = vpow2.f32 %v1554_v36  ;;  %v1883_v5 = vsub.f32 %v5244_v35, %v1882_v2  ;;  %v2049_v63 = vsub.f32 %v5248_v37, %v2048_v59 }
 0x307   :  { %4797 = vpow2.f32 %v1643_v38 }
 0x308   :  { %v1884_v61 = vmul.f32 1.442695, %v1883_v5 }
 0x309   :  { %v2213_v55 = vpop.xlane.xlu1 %2212 }
 0x30a   :  { %896 = vadd.xlane.f32.xlu0 %v895_v27  ;;  %4799 = vpow2.f32 %v1884_v61  ;;  %v2214_v35 = vsub.f32 %v5250_v39, %v2213_v55 }
 0x30c   :  { %v5350_v29 = vpop.eup %4791  ;;  %v2215_v37 = vmul.f32 1.442695, %v2214_v35 }
 0x30d   :  { %v1225_v42 = vsel %vm153_vm2, %v5350_v29, 0.0  ;;  %v5356_v31 = vpop.eup %4793  ;;  %v2302_v7 = vpop.xlane.xlu1 %2301 }
 0x30e   :  { %1226 = vadd.xlane.f32.xlu1 %v1225_v42  ;;  %3864 = vmax.xlane.f32.xlu0 %v3863_v33  ;;  %v1391_v13 = vsel %vm153_vm2, %v5356_v31, 0.0  ;;  %v2303_v1 = vsub.f32 %v5252_v41, %v2302_v7 }
 0x310   :  { %v5358_v44 = vpop.eup %4795  ;;  %v2304_v12 = vmul.f32 1.442695, %v2303_v1 }
 0x311   :  { %v1556_v47 = vsel %vm153_vm2, %v5358_v44, 0.0  ;;  %v5364_v49 = vpop.eup %4797  ;;  %v2543_v57 = vpop.xlane.xlu1 %2542 }
 0x312   :  { %1392 = vadd.xlane.f32.xlu0 %v1391_v13  ;;  %1557 = vadd.xlane.f32.xlu1 %v1556_v47  ;;  %v1645_v53 = vsel %vm153_vm2, %v5364_v49, 0.0  ;;  %v2544_v14 = vsub.f32 %v5254_v43, %v2543_v57 }
 0x314   :  { %v5391_v16 = vpop.eup %4799  ;;  %v2545_v41 = vmul.f32 1.442695, %v2544_v14 }
 0x315   :  { %v2709_v0 = vpop.xlane.xlu1 %2708  ;;  %v1886_v39 = vsel %vm153_vm2, %v5391_v16, 0.0 }
 0x316   :  { %4030 = vmax.xlane.f32.xlu0 %v4029_v51  ;;  %1646 = vadd.xlane.f32.xlu1 %v1645_v53  ;;  %v2710_v18 = vsub.f32 %v5256_v45, %v2709_v0 }
 0x318   :  { %v2711_v25 = vmul.f32 1.442695, %v2710_v18 }
 0x319   :  { %v2874_v4 = vpop.xlane.xlu1 %2873 }
 0x31a   :  { %v2875_v45 = vsub.f32 %v5258_v46, %v2874_v4 }
 0x31c   :  { %v2876_v27 = vmul.f32 1.442695, %v2875_v45 }
 0x327   :  { %1230 = vrot.lane.b32.xlu1 %v4997_v19, %s4910_s17 }
 0x32c   :  { %1396 = vrot.lane.b32.xlu0 %v4997_v19, %s4911_s18  ;;  %v2050_v19 = vmul.f32 1.442695, %v2049_v63 }
 0x32e   :  { %4801 = vpow2.f32 %v2050_v19 }
 0x32f   :  { %4803 = vpow2.f32 %v2304_v12 }
 0x330   :  { %1650 = vrot.lane.b32.xlu0 %v5015_v20, %s4909_s16  ;;  %4805 = vpow2.f32 %v2215_v37 }
 0x331   :  { %4807 = vpow2.f32 %v2545_v41 }
 0x332   :  { %4809 = vpow2.f32 %v2711_v25 }
 0x334   :  { %1726 = vrot.lane.b32.xlu0 %v5015_v20, %s4908_s15 }
 0x338   :  { %1891 = vrot.lane.b32.xlu0 %v5015_v20, %s4910_s17  ;;  %v5398_v24 = vpop.eup %4801 }
 0x339   :  { %v2052_v30 = vsel %vm153_vm2, %v5398_v24, 0.0  ;;  %v5405_v34 = vpop.eup %4803 }
 0x33a   :  { %v5412_v38 = vpop.eup %4805 }
 0x33b   :  { %v2217_v33 = vsel %vm153_vm2, %v5412_v38, 0.0  ;;  %v5419_v46 = vpop.eup %4807 }
 0x33c   :  { %2057 = vrot.lane.b32.xlu0 %v5015_v20, %s4911_s18  ;;  %v2963_v20 = vpop.xlane.xlu1 %2962  ;;  %v2547_v2 = vsel %vm153_vm2, %v5419_v46, 0.0  ;;  %v5426_v55 = vpop.eup %4809 }
 0x33d   :  { %v2964_v26 = vsub.f32 %v5260_v48, %v2963_v20 }
 0x33f   :  { %v2965_v15 = vmul.f32 1.442695, %v2964_v26 }
 0x340   :  { %2311 = vrot.lane.b32.xlu0 %v5025_v21, %s4909_s16  ;;  %v3204_v43 = vpop.xlane.xlu1 %3203 }
 0x341   :  { %4811 = vpow2.f32 %v2965_v15  ;;  %v3205_v42 = vsub.f32 %v5262_v50, %v3204_v43 }
 0x342   :  { %4813 = vpow2.f32 %v2876_v27 }
 0x343   :  { %v3206_v47 = vmul.f32 1.442695, %v3205_v42 }
 0x344   :  { %2387 = vrot.lane.b32.xlu0 %v5025_v21, %s4908_s15  ;;  %v3370_v36 = vpop.xlane.xlu1 %3369 }
 0x345   :  { %v3371_v51 = vsub.f32 %v5268_v54, %v3370_v36  ;;  %4815 = vpow2.f32 %v3206_v47  ;;  %v2713_v54 = vsel %vm153_vm2, %v5426_v55, 0.0 }
 0x347   :  { %v3372_v50 = vmul.f32 1.442695, %v3371_v51 }
 0x348   :  { %2552 = vrot.lane.b32.xlu0 %v5025_v21, %s4910_s17  ;;  %v3535_v13 = vpop.xlane.xlu1 %3534 }
 0x349   :  { %v3536_v7 = vsub.f32 %v5274_v58, %v3535_v13 }
 0x34b   :  { %1887 = vadd.xlane.f32.xlu1 %v1886_v39  ;;  %v5433_v59 = vpop.eup %4811  ;;  %v3537_v61 = vmul.f32 1.442695, %v3536_v7 }
 0x34c   :  { %2718 = vrot.lane.b32.xlu0 %v5025_v21, %s4911_s18  ;;  %v2306_v21 = vsel %vm153_vm2, %v5405_v34, 0.0  ;;  %v3624_v5 = vpop.xlane.xlu1 %3623  ;;  %v2967_v63 = vsel %vm153_vm2, %v5433_v59, 0.0  ;;  %v5440_v58 = vpop.eup %4813 }
 0x34d   :  { %v2878_v19 = vsel %vm153_vm2, %v5440_v58, 0.0 }
 0x34f   :  { %2053 = vadd.xlane.f32.xlu1 %v2052_v30  ;;  %v5446_v1 = vpop.eup %4815 }
 0x350   :  { %2972 = vrot.lane.b32.xlu0 %v5047_v22, %s4909_s16  ;;  %v3208_v35 = vsel %vm153_vm2, %v5446_v1, 0.0 }
 0x353   :  { %2307 = vadd.xlane.f32.xlu1 %v2306_v21 }
 0x354   :  { %3048 = vrot.lane.b32.xlu0 %v5047_v22, %s4908_s15 }
 0x355   :  { %v236_v48 = vpop.xlane.xlu0 %235 }
 0x357   :  { %2218 = vadd.xlane.f32.xlu1 %v2217_v33 }
 0x358   :  { %3213 = vrot.lane.b32.xlu0 %v5047_v22, %s4910_s17 }
 0x35a   :  { %v566_v53 = vpop.xlane.xlu0 %565 }
 0x35b   :  { %2548 = vadd.xlane.f32.xlu1 %v2547_v2 }
 0x35c   :  { %3379 = vrot.lane.b32.xlu0 %v5047_v22, %s4911_s18  ;;  %v3625_v22 = vsub.f32 %v5280_v62, %v3624_v5 }
 0x35e   :  { %v325_v57 = vpop.xlane.xlu0 %324  ;;  %v3626_v0 = vmul.f32 1.442695, %v3625_v22 }
 0x35f   :  { %4817 = vrcp.f32 %v325_v57  ;;  %2714 = vadd.xlane.f32.xlu1 %v2713_v54 }
 0x360   :  { %3633 = vrot.lane.b32.xlu0 %v4991_v17, %s4909_s16  ;;  %4819 = vpow2.f32 %v3372_v50 }
 0x361   :  { %4821 = vrcp.f32 %v236_v48 }
 0x362   :  { %4823 = vpow2.f32 %v3537_v61  ;;  %v732_v41 = vpop.xlane.xlu0 %731 }
 0x363   :  { %2968 = vadd.xlane.f32.xlu1 %v2967_v63  ;;  %4825 = vpow2.f32 %v3626_v0 }
 0x364   :  { %3874 = vrot.lane.b32.xlu0 %v4991_v17, %s4910_s17  ;;  %4827 = vrcp.f32 %v566_v53 }
 0x365   :  { %4829 = vrcp.f32 %v732_v41 }
 0x367   :  { %2879 = vadd.xlane.f32.xlu1 %v2878_v19 }
 0x368   :  { %4040 = vrot.lane.b32.xlu0 %v4991_v17, %s4911_s18 }
 0x369   :  { %v4818_v62 = vpop.eup %4817 }
 0x36a   :  { %v327_v4 = vmul.f32 %v4818_v62, %v5323_v11  ;;  %v5453_v12 = vpop.eup %4819 }
 0x36b   :  { %3209 = vadd.xlane.f32.xlu1 %v3208_v35  ;;  %v4822_v37 = vpop.eup %4821  ;;  %v3374_v11 = vsel %vm153_vm2, %v5453_v12, 0.0 }
 0x36c   :  { %4488 = vmatmul.mubr.msk.f32.vlgmr.msra.gmra.mrb[4].mxu1 %vm153_vm2, %v327_v4  ;;  %v5462_v14 = vpop.eup %4823  ;;  %v238_v20 = vmul.f32 %v4822_v37, %v5314_v52 }
 0x36d   :  { %4491 = vmatpush3.msra.mxu1 %v5306_v28  ;;  %4492 = vmatprep.mubr.msk.f32.mxu1 %vm4900_vm1, %v4899_v9  ;;  %v3539_v18 = vsel %vm153_vm2, %v5462_v14, 0.0  ;;  %v5467_v39 = vpop.eup %4825  ;;  %v986_v28 = vpop.xlane.xlu1 %985 }
 0x36e   :  { %4500 = vmatprep.subr.mxu1 %v4899_v9  ;;  %v4828_v43 = vpop.eup %4827  ;;  %v3628_v52 = vsel %vm153_vm2, %v5467_v39, 0.0  ;;  %4831 = vrcp.f32 %v986_v28 }
 0x36f   :  { %3375 = vadd.xlane.f32.xlu1 %v3374_v11  ;;  %v568_v25 = vmul.f32 %v4828_v43, %v5319_v56 }
 0x373   :  { %3540 = vadd.xlane.f32.xlu1 %v3539_v18 }
 0x374   :  { %4493 = vmatmul.mubr.msk.f32.vlgmr.msra.gmra.mrb[4].mxu1 %vm153_vm2, %v238_v20 }
 0x375   :  { %4501 = vmatpush3.msra.mxu1 %v5308_v32  ;;  %4502 = vmatprep.mubr.msk.f32.mxu1 %vm4900_vm1, %v4899_v9  ;;  %v4830_v32 = vpop.eup %4829 }
 0x376   :  { %4510 = vmatprep.subr.mxu1 %v4899_v9  ;;  %v734_v26 = vmul.f32 %v4830_v32, %v5327_v60 }
 0x377   :  { %3629 = vadd.xlane.f32.xlu1 %v3628_v52 }
 0x378   :  { %v4832_v30 = vpop.eup %4831 }
 0x379   :  { %v988_v56 = vmul.f32 %v4832_v30, %v5331_v23 }
 0x37c   :  { %4503 = vmatmul.mubr.msk.f32.vlgmr.msra.gmra.mrb[4].mxu1 %vm153_vm2, %v568_v25 }
 0x37d   :  { %4511 = vmatpush3.msra.mxu1 %v5338_v6  ;;  %4512 = vmatprep.mubr.msk.f32.mxu1 %vm4900_vm1, %v4899_v9  ;;  %v1066_v6 = vpop.permute.xlu0 %1065 }
 0x37e   :  { %4525 = vmatprep.subr.mxu1 %v4899_v9 }
 0x384   :  { %4513 = vmatmul.mubr.msk.f32.vlgmr.msra.gmra.mrb[4].mxu1 %vm153_vm2, %v734_v26 }
 0x385   :  { %4526 = vmatpush3.msra.mxu1 %v5340_v10  ;;  %4527 = vmatprep.mubr.msk.f32.mxu1 %vm4900_vm1, %v4899_v9 }
 0x386   :  { %4530 = vmatprep.subr.mxu1 %v4899_v9 }
 0x388   :  { %4528 = vmatmul.mubr.msk.f32.vlgmr.msra.gmra.mrb[6].mxu1 %vm153_vm2, %v988_v56 }
 0x389   :  { %4531 = vmatpush3.msra.mxu1 %v1066_v6  ;;  %4532 = vmatprep.mubr.msk.f32.mxu1 %vm4900_vm1, %v4899_v9 }
 0x38a   :  { %4540 = vmatprep.subr.mxu1 %v4899_v9 }
 0x397   :  { %v897_v60 = vpop.xlane.xlu0 %896 }
 0x398   :  { %4833 = vrcp.f32 %v897_v60 }
 0x39b   :  { %v1227_v45 = vpop.xlane.xlu1 %1226  ;;  %v3865_v10 = vpop.xlane.xlu0 %3864 }
 0x39c   :  { %v3866_v15 = vsub.f32 %v5286_v3, %v3865_v10  ;;  %4835 = vrcp.f32 %v1227_v45 }
 0x39e   :  { %v3867_v36 = vmul.f32 1.442695, %v3866_v15 }
 0x39f   :  { %v1393_v23 = vpop.xlane.xlu0 %1392  ;;  %v1558_v21 = vpop.xlane.xlu1 %1557 }
 0x3a0   :  { %4837 = vpow2.f32 %v3867_v36 }
 0x3a1   :  { %4839 = vrcp.f32 %v1393_v23 }
 0x3a2   :  { %v4834_v48 = vpop.eup %4833 }
 0x3a3   :  { %v899_v27 = vmul.f32 %v4834_v48, %v5346_v40  ;;  %v4031_v42 = vpop.xlane.xlu0 %4030  ;;  %v1647_v33 = vpop.xlane.xlu1 %1646 }
 0x3a4   :  { %v4032_v13 = vsub.f32 %v5290_v8, %v4031_v42 }
 0x3a5   :  { %4533 = vmatmul.mubr.msk.f32.vlgmr.msra.gmra.mrb[6].mxu1 %vm153_vm2, %v899_v27 }
 0x3a6   :  { %v4033_v47 = vmul.f32 1.442695, %v4032_v13  ;;  %4542 = vmatprep.mubr.msk.f32.mxu1 %vm4900_vm1, %v4899_v9  ;;  %v4836_v3 = vpop.eup %4835 }
 0x3a7   :  { %v1231_v51 = vpop.permute.xlu1 %1230  ;;  %v1229_v40 = vmul.f32 %v4836_v3, %v5350_v29  ;;  %v1397_v2 = vpop.permute.xlu0 %1396 }
 0x3a8   :  { %4841 = vpow2.f32 %v4033_v47  ;;  %4541 = vmatpush3.msra.mxu1 %v1231_v51 }
 0x3a9   :  { %4843 = vrcp.f32 %v1647_v33  ;;  %4550 = vmatprep.subr.mxu1 %v4899_v9 }
 0x3aa   :  { %v5499_v53 = vpop.eup %4837  ;;  %4845 = vrcp.f32 %v1558_v21 }
 0x3ab   :  { %v3869_v8 = vsel %vm153_vm2, %v5499_v53, 0.0  ;;  %v4840_v50 = vpop.eup %4839  ;;  %v1651_v29 = vpop.permute.xlu0 %1650 }
 0x3ac   :  { %3870 = vadd.xlane.f32.xlu1 %v3869_v8  ;;  %v1395_v57 = vmul.f32 %v4840_v50, %v5356_v31 }
 0x3ad   :  { %4543 = vmatmul.mubr.msk.f32.vlgmr.msra.gmra.mrb[6].mxu1 %vm153_vm2, %v1229_v40 }
 0x3ae   :  { %4551 = vmatpush3.msra.mxu1 %v1397_v2  ;;  %4552 = vmatprep.mubr.msk.f32.mxu1 %vm4900_vm1, %v4899_v9 }
 0x3af   :  { %4565 = vmatprep.subr.mxu1 %v4899_v9  ;;  %v1727_v22 = vpop.permute.xlu0 %1726 }
 0x3b2   :  { %v5509_v7 = vpop.eup %4841 }
 0x3b3   :  { %v4035_v5 = vsel %vm153_vm2, %v5509_v7, 0.0  ;;  %v4844_v54 = vpop.eup %4843  ;;  %v1892_v0 = vpop.permute.xlu0 %1891 }
 0x3b4   :  { %4036 = vadd.xlane.f32.xlu1 %v4035_v5  ;;  %v1649_v61 = vmul.f32 %v4844_v54, %v5364_v49  ;;  %v4846_v31 = vpop.eup %4845 }
 0x3b5   :  { %4553 = vmatmul.mubr.msk.f32.vlgmr.msra.gmra.mrb[6].mxu1 %vm153_vm2, %v1395_v57  ;;  %v1560_v63 = vmul.f32 %v4846_v31, %v5358_v44 }
 0x3b6   :  { %4566 = vmatpush3.msra.mxu1 %v1651_v29  ;;  %4567 = vmatprep.mubr.msk.f32.mxu1 %vm4900_vm1, %v4899_v9 }
 0x3b7   :  { %4570 = vmatprep.subr.mxu1 %v4899_v9  ;;  %v2058_v35 = vpop.permute.xlu0 %2057 }
 0x3b9   :  { %4568 = vmatmul.mubr.msk.f32.vlgmr.msra.gmra.mrb[8].mxu1 %vm153_vm2, %v1649_v61 }
 0x3ba   :  { %4571 = vmatpush3.msra.mxu1 %v1727_v22  ;;  %4572 = vmatprep.mubr.msk.f32.mxu1 %vm4900_vm1, %v4899_v9 }
 0x3bb   :  { %4580 = vmatprep.subr.mxu1 %v4899_v9  ;;  %v2312_v11 = vpop.permute.xlu0 %2311 }
 0x3bf   :  { %v2388_v28 = vpop.permute.xlu0 %2387 }
 0x3c1   :  { %4573 = vmatmul.mubr.msk.f32.vlgmr.msra.gmra.mrb[8].mxu1 %vm153_vm2, %v1560_v63 }
 0x3c2   :  { %4581 = vmatpush3.msra.mxu1 %v1892_v0  ;;  %4582 = vmatprep.mubr.msk.f32.mxu1 %vm4900_vm1, %v4899_v9 }
 0x3c3   :  { %4590 = vmatprep.subr.mxu1 %v4899_v9  ;;  %v2553_v25 = vpop.permute.xlu0 %2552 }
 0x3c5   :  { %3709 = vrot.lane.b32.xlu1 %v4991_v17, %s4908_s15 }
 0x3c7   :  { %v2719_v56 = vpop.permute.xlu0 %2718 }
 0x3cb   :  { %v2973_v60 = vpop.permute.xlu0 %2972 }
 0x3cf   :  { %v3049_v36 = vpop.permute.xlu0 %3048 }
 0x3d3   :  { %v3214_v48 = vpop.permute.xlu0 %3213 }
 0x3d7   :  { %v3380_v33 = vpop.permute.xlu0 %3379 }
 0x3d8   :  { %v1888_v49 = vpop.xlane.xlu1 %1887 }
 0x3d9   :  { %4847 = vrcp.f32 %v1888_v49 }
 0x3db   :  { %v3634_v3 = vpop.permute.xlu0 %3633 }
 0x3dc   :  { %v2054_v19 = vpop.xlane.xlu1 %2053 }
 0x3dd   :  { %4849 = vrcp.f32 %v2054_v19  ;;  %v4147_v19 = vld [vmem:[%s5618_s3] sm:$0xff] }
 0x3de   :  { %4716 = vmatpush3.msra.mxu0 %v4147_v19 }
 0x3df   :  { %v3875_v50 = vpop.permute.xlu0 %3874 }
 0x3e0   :  { %v2308_v62 = vpop.xlane.xlu1 %2307 }
 0x3e1   :  { %4851 = vrcp.f32 %v2308_v62 }
 0x3e3   :  { %v4848_v4 = vpop.eup %4847  ;;  %v4041_v29 = vpop.permute.xlu0 %4040 }
 0x3e4   :  { %v1890_v44 = vmul.f32 %v4848_v4, %v5391_v16  ;;  %v2219_v37 = vpop.xlane.xlu1 %2218 }
 0x3e5   :  { %4853 = vrcp.f32 %v2219_v37 }
 0x3e6   :  { %4583 = vmatmul.mubr.msk.f32.vlgmr.msra.gmra.mrb[8].mxu1 %vm153_vm2, %v1890_v44 }
 0x3e7   :  { %4591 = vmatpush3.msra.mxu1 %v2058_v35  ;;  %4592 = vmatprep.mubr.msk.f32.mxu1 %vm4900_vm1, %v4899_v9  ;;  %v4850_v17 = vpop.eup %4849 }
 0x3e8   :  { %4605 = vmatprep.subr.mxu1 %v4899_v9  ;;  %v2056_v20 = vmul.f32 %v4850_v17, %v5398_v24  ;;  %v2549_v18 = vpop.xlane.xlu1 %2548 }
 0x3e9   :  { %4855 = vrcp.f32 %v2549_v18 }
 0x3eb   :  { %v4852_v41 = vpop.eup %4851 }
 0x3ec   :  { %v2310_v16 = vmul.f32 %v4852_v41, %v5405_v34  ;;  %v2715_v24 = vpop.xlane.xlu1 %2714 }
 0x3ed   :  { %4857 = vrcp.f32 %v2715_v24 }
 0x3ee   :  { %4593 = vmatmul.mubr.msk.f32.vlgmr.msra.gmra.mrb[8].mxu1 %vm153_vm2, %v2056_v20 }
 0x3ef   :  { %4606 = vmatpush3.msra.mxu1 %v2312_v11  ;;  %4607 = vmatprep.mubr.msk.f32.mxu1 %vm4900_vm1, %v4899_v9  ;;  %v4854_v43 = vpop.eup %4853 }
 0x3f0   :  { %4610 = vmatprep.subr.mxu1 %v4899_v9  ;;  %v2221_v52 = vmul.f32 %v4854_v43, %v5412_v38  ;;  %v2969_v32 = vpop.xlane.xlu1 %2968  ;;  %v4354_v43 = vld [vmem:[%s5619_s4] ss:$0 sm:$0xff] }
 0x3f1   :  { %4859 = vrcp.f32 %v2969_v32 }
 0x3f2   :  { %4608 = vmatmul.mubr.msk.f32.vlgmr.msra.gmra.mrb[10].mxu1 %vm153_vm2, %v2310_v16 }
 0x3f3   :  { %4611 = vmatpush3.msra.mxu1 %v2388_v28  ;;  %4612 = vmatprep.mubr.msk.f32.mxu1 %vm4900_vm1, %v4899_v9  ;;  %v4856_v34 = vpop.eup %4855 }
 0x3f4   :  { %4620 = vmatprep.subr.mxu1 %v4899_v9  ;;  %v2551_v26 = vmul.f32 %v4856_v34, %v5419_v46  ;;  %v2880_v30 = vpop.xlane.xlu1 %2879 }
 0x3f5   :  { %4861 = vrcp.f32 %v2880_v30 }
 0x3f7   :  { %v4858_v38 = vpop.eup %4857 }
 0x3f8   :  { %v3210_v6 = vpop.xlane.xlu1 %3209  ;;  %v2717_v45 = vmul.f32 %v4858_v38, %v5426_v55 }
 0x3f9   :  { %4863 = vrcp.f32 %v3210_v6 }
 0x3fa   :  { %4613 = vmatmul.mubr.msk.f32.vlgmr.msra.gmra.mrb[10].mxu1 %vm153_vm2, %v2221_v52 }
 0x3fb   :  { %4621 = vmatpush3.msra.mxu1 %v2553_v25  ;;  %4622 = vmatprep.mubr.msk.f32.mxu1 %vm4900_vm1, %v4899_v9  ;;  %v4860_v10 = vpop.eup %4859 }
 0x3fc   :  { %4630 = vmatprep.subr.mxu1 %v4899_v9  ;;  %v2971_v46 = vmul.f32 %v4860_v10, %v5433_v59  ;;  %v3376_v15 = vpop.xlane.xlu1 %3375 }
 0x3fd   :  { %4865 = vrcp.f32 %v3376_v15 }
 0x3ff   :  { %v4862_v55 = vpop.eup %4861 }
 0x400   :  { %v3541_v23 = vpop.xlane.xlu1 %3540  ;;  %v2882_v21 = vmul.f32 %v4862_v55, %v5440_v58 }
 0x402   :  { %4623 = vmatmul.mubr.msk.f32.vlgmr.msra.gmra.mrb[10].mxu1 %vm153_vm2, %v2551_v26 }
 0x403   :  { %4631 = vmatpush3.msra.mxu1 %v2719_v56  ;;  %4632 = vmatprep.mubr.msk.f32.mxu1 %vm4900_vm1, %v4899_v9  ;;  %v4864_v27 = vpop.eup %4863 }
 0x404   :  { %4645 = vmatprep.subr.mxu1 %v4899_v9  ;;  %v3630_v59 = vpop.xlane.xlu1 %3629  ;;  %v3212_v42 = vmul.f32 %v4864_v27, %v5446_v1 }
 0x405   :  { %4867 = vrcp.f32 %v3630_v59 }
 0x406   :  { %4869 = vrcp.f32 %v3541_v23 }
 0x407   :  { %v4866_v58 = vpop.eup %4865 }
 0x408   :  { %v3378_v13 = vmul.f32 %v4866_v58, %v5453_v12 }
 0x40a   :  { %4633 = vmatmul.mubr.msk.f32.vlgmr.msra.gmra.mrb[10].mxu1 %vm153_vm2, %v2717_v45 }
 0x40b   :  { %4646 = vmatpush3.msra.mxu1 %v2973_v60  ;;  %4647 = vmatprep.mubr.msk.f32.mxu1 %vm4900_vm1, %v4899_v9 }
 0x40c   :  { %4650 = vmatprep.subr.mxu1 %v4899_v9 }
 0x40e   :  { %4648 = vmatmul.mubr.msk.f32.vlgmr.msra.gmra.mrb[12].mxu1 %vm153_vm2, %v2971_v46 }
 0x40f   :  { %4651 = vmatpush3.msra.mxu1 %v3049_v36  ;;  %4652 = vmatprep.mubr.msk.f32.mxu1 %vm4900_vm1, %v4899_v9  ;;  %v4868_v47 = vpop.eup %4867 }
 0x410   :  { %4660 = vmatprep.subr.mxu1 %v4899_v9  ;;  %v3632_v1 = vmul.f32 %v4868_v47, %v5467_v39  ;;  %v4870_v40 = vpop.eup %4869 }
 0x411   :  { %v3543_v8 = vmul.f32 %v4870_v40, %v5462_v14 }
 0x416   :  { %4653 = vmatmul.mubr.msk.f32.vlgmr.msra.gmra.mrb[12].mxu1 %vm153_vm2, %v2882_v21 }
 0x417   :  { %4661 = vmatpush3.msra.mxu1 %v3214_v48  ;;  %4662 = vmatprep.mubr.msk.f32.mxu1 %vm4900_vm1, %v4899_v9 }
 0x418   :  { %4670 = vmatprep.subr.mxu1 %v4899_v9 }
 0x41e   :  { %4663 = vmatmul.mubr.msk.f32.vlgmr.msra.gmra.mrb[12].mxu1 %vm153_vm2, %v3212_v42 }
 0x41f   :  { %4671 = vmatpush3.msra.mxu1 %v3380_v33  ;;  %4672 = vmatprep.mubr.msk.f32.mxu1 %vm4900_vm1, %v4899_v9 }
 0x420   :  { %4685 = vmatprep.subr.mxu1 %v4899_v9 }
 0x426   :  { %4673 = vmatmul.mubr.msk.f32.vlgmr.msra.gmra.mrb[12].mxu1 %vm153_vm2, %v3378_v13 }
 0x427   :  { %4686 = vmatpush3.msra.mxu1 %v3634_v3  ;;  %4687 = vmatprep.mubr.msk.f32.mxu1 %vm4900_vm1, %v4899_v9 }
 0x428   :  { %4690 = vmatprep.subr.mxu1 %v4899_v9 }
 0x42a   :  { %4688 = vmatmul.mubr.msk.f32.vlgmr.msra.gmra.mrb[14].mxu1 %vm153_vm2, %v3632_v1 }
 0x42b   :  { %4692 = vmatprep.mubr.msk.f32.mxu1 %vm4900_vm1, %v4899_v9 }
 0x439   :  { %v3871_v51 = vpop.xlane.xlu1 %3870 }
 0x43a   :  { %4871 = vrcp.f32 %v3871_v51 }
 0x441   :  { %v4037_v12 = vpop.xlane.xlu1 %4036 }
 0x442   :  { %4873 = vrcp.f32 %v4037_v12 }
 0x444   :  { %v4872_v39 = vpop.eup %4871 }
 0x445   :  { %v3710_v2 = vpop.permute.xlu1 %3709  ;;  %v3873_v57 = vmul.f32 %v4872_v39, %v5499_v53 }
 0x446   :  { %4691 = vmatpush3.msra.mxu1 %v3710_v2 }
 0x447   :  { %4693 = vmatmul.mubr.msk.f32.vlgmr.msra.gmra.mrb[14].mxu1 %vm153_vm2, %v3543_v8  ;;  %4700 = vmatprep.subr.mxu1 %v4899_v9 }
 0x448   :  { %4701 = vmatpush3.msra.mxu1 %v3875_v50  ;;  %4702 = vmatprep.mubr.msk.f32.mxu1 %vm4900_vm1, %v4899_v9 }
 0x449   :  { %4710 = vmatprep.subr.mxu1 %v4899_v9 }
 0x44c   :  { %v4874_v14 = vpop.eup %4873 }
 0x44d   :  { %v4039_v5 = vmul.f32 %v4874_v14, %v5509_v7 }
 0x44f   :  { %4703 = vmatmul.mubr.msk.f32.vlgmr.msra.gmra.mrb[14].mxu1 %vm153_vm2, %v3873_v57 }
 0x450   :  { %4711 = vmatpush3.msra.mxu1 %v4041_v29  ;;  %4712 = vmatprep.mubr.msk.f32.mxu1 %vm4900_vm1, %v4899_v9 }
 0x457   :  { %v807_v54 = vpop.f32.mrb[4].mxu1  ;;  %4713 = vmatmul.mubr.msk.f32.vlgmr.msra.gmra.mrb[14].mxu1 %vm153_vm2, %v4039_v5 }
 0x458   :  { %v4514_v61 = vpop.f32.mrb[5].mxu1 }
 0x488   :  { %v1468_v22 = vpop.f32.mrb[6].mxu1 }
 0x489   :  { %4118 = vrot.lane.b32.xlu0 %v1468_v22, %s4912_s19  ;;  %v4554_v31 = vpop.f32.mrb[7].mxu1 }
 0x4c1   :  { %v2129_v63 = vpop.f32.mrb[8].mxu1 }
 0x4c2   :  { %4122 = vrot.lane.b32.xlu0 %v2129_v63, %s4913_s20  ;;  %v4594_v53 = vpop.f32.mrb[9].mxu1 }
 0x4dd   :  { %v2790_v0 = vpop.f32.mrb[10].mxu1 }
 0x4de   :  { %4126 = vrot.lane.b32.xlu0 %v2790_v0, %s4914_s21  ;;  %v4634_v49 = vpop.f32.mrb[11].mxu1 }
 0x4f9   :  { %v3451_v9 = vpop.f32.mrb[12].mxu1 }
 0x4fa   :  { %4130 = vrot.lane.b32.xlu1 %v3451_v9, %s4915_s22  ;;  %v4674_v7 = vpop.f32.mrb[13].mxu1 }
 0x4fb   :  { %v4119_v44 = vpop.permute.xlu0 %4118 }
 0x4fc   :  { %v4138_v17 = vsel %vm4137_vm3, %v807_v54, %v4119_v44 }
 0x52a   :  { %v4112_v62 = vpop.f32.mrb[14].mxu1 }
 0x52b   :  { %4134 = vrot.lane.b32.xlu0 %v4112_v62, %s4916_s25  ;;  %v4714_v4 = vpop.f32.mrb[15].mxu1 }
 0x534   :  { %v4123_v35 = vpop.permute.xlu0 %4122 }
 0x535   :  { %v4140_v20 = vsel %vm4139_vm4, %v4138_v17, %v4123_v35 }
 0x550   :  { %v4127_v37 = vpop.permute.xlu0 %4126 }
 0x551   :  { %v4142_v41 = vsel %vm4141_vm5, %v4140_v20, %v4127_v37 }
 0x56c   :  { %v4131_v11 = vpop.permute.xlu1 %4130 }
 0x56d   :  { %v4144_v18 = vsel %vm4143_vm6, %v4142_v41, %v4131_v11 }
 0x59d   :  { %v4135_v16 = vpop.permute.xlu0 %4134 }
 0x59e   :  { %v4146_v28 = vsel %vm4145_vm7, %v4144_v18, %v4135_v16 }
 0x59f   :  { %4155 = vxpose.xlu1.b32.start.end [1/1] (short) (narrow) %v4146_v28, 8 }
 0x61f   :  { %v4171_v24 = vpop.trf.xlu1 }
 0x620   :  { %4718 = vmatmul.mubr.msk.f32.vlgmr.msra.gmra.mrb[50].mxu0 %vm153_vm2, %v4171_v24 }
 0x6f3   :  { %v4256_v52 = vpop.f32.mrb[50].mxu0 }
 0x6f4   :  { %v4257_v25 = vadd.f32 %v4354_v43, %v4256_v52  ;;  %v4719_v32 = vpop.f32.mrb[51].mxu0 }
 0x6f6   :  { %4260 = vst [vmem:[#allocation2] sm:$0x3f] %v4257_v25 }
 0x6f7   :  { %4886 = shalt.err (!%p4883_p4)
}
 0x6f8   :  { %s4887_s6 = scalar_lea.hbm %s5620_s5, 128 }
 0x6f9   :  { %p4888_p5 = scmp.ne.s32.totalorder %s5620_s5, %s4887_s6  ;;  %p4891_p6 = scmp.lt.u32.totalorder %s4887_s6, %s5620_s5 }
 0x6fb   :  { %p4893_p7 = pnand %p4891_p6, %p4888_p5 }
 0x6fd   :  { %4896 = shalt.err (!%p4893_p7)
}
 0x6fe   :  { %4270 = dma.vmem_to_hbm [thread:$0]  %s4268_s1, 128, %s5620_s5, [#allocation3]  }
 0x6ff   :  { %4897 = dma.done.wait [#allocation3], 128  }
 0x700   :  { %4898 = vsyncadd [#allocation3], 4294967168 }
 0x701   :  { %4274 = vsyncpa [#allocation3], 1 }

</bundles_post_ra>
